<compile_context>
chip_gen: v7x
topology: tpu7x:2x2x1
jax: 0.10.0
libtpu: 0.0.40
codegen_flags: <defaults>
</compile_context>

<pallas_src>
import functools

import jax
import jax.numpy as jnp
from jax import lax
from jax.experimental import pallas as pl
from jax.experimental.pallas import tpu as pltpu

D_MODEL = 64
HIDDEN = 32          # per-MLP hidden width; the merged MLP has H = 3 * HIDDEN
FFN_DIM = 128
LN_EPS = 1e-5
LANE = 128           # q/k/v start lanes inside the fused QKV output


def _encoder_kernel(x_ref, cj_ref, ci_ref,
                    wqkv_ref, w1m_ref, b1m_ref, w2m_ref,
                    ln1_g_ref, ln1_b_ref,
                    wf1_ref, bf1_ref, wf2_ref, bf2_ref,
                    ln2_g_ref, ln2_b_ref,
                    o_ref,
                    qkv_scr, attn_scr,
                    *, compute_dtype):
    bb, S, D = x_ref.shape

    def mm(a, b):
        return jnp.dot(a.astype(compute_dtype), b.astype(compute_dtype),
                       preferred_element_type=jnp.float32)

    def mm_nt(a, b):  # a @ b.T via dot_general (MXU transposed-RHS path, no XLU transpose)
        return lax.dot_general(a.astype(compute_dtype), b.astype(compute_dtype),
                               (((1,), (1,)), ((), ())),
                               preferred_element_type=jnp.float32)

    # ---- fused QKV on the flattened (bb*S, D) slab; Wq pre-scaled by 1/sqrt(D) ----
    qkv_scr[...] = mm(x_ref[...].reshape(bb * S, D), wqkv_ref[...])   # (bb*S, 3*LANE)

    w1m = w1m_ref[...]     # (H, 5)  merged rot/trans/reflect first layer
    b1m = b1m_ref[...]     # (H, 1)
    w2m = w2m_ref[...]     # (1, H)

    def attn_body(b, carry):
        # ---- pairwise geometric features, lane-dense on the flat pair axis p = i*S + j ----
        cj = cj_ref[b]                              # (2, S*S): [cx_j ; cy_j]
        ci = ci_ref[b]                              # (2, S*S): [cx_i ; cy_i]
        d = cj - ci                                 # coords_j - coords_i
        dx = d[0:1, :]
        dy = d[1:2, :]
        r2 = dx * dx + dy * dy
        dist = jnp.sqrt(r2 + 1e-8)
        nz = r2 > 0.0
        inv_r = lax.rsqrt(jnp.where(nz, r2, 1.0))   # EUP
        sin_t = jnp.where(nz, dy * inv_r, 0.0)      # sin(atan2(dy, dx)); atan2(0,0)=0
        cos_t = jnp.where(nz, dx * inv_r, 1.0)
        feats = jnp.concatenate([dist, sin_t, cos_t, dx, dy], axis=0)   # (5, S*S)

        # ---- merged 5 -> H -> 1 geometric MLP: two small MXU matmuls, no kron ----
        hid = jnp.maximum(mm(w1m, feats) + b1m, 0.0)                    # (H, S*S)
        psi_flat = mm(w2m, hid)                                         # (1, S*S)
        # de-flatten (1, S*S) -> (S, S): S contiguous lane slices stacked on sublanes
        psi = jnp.concatenate(
            [psi_flat[:, i * S:(i + 1) * S] for i in range(S)], axis=0)  # (S, S)

        # ---- attention for this batch element ----
        row0 = pl.multiple_of(b * S, S)
        q = qkv_scr[pl.ds(row0, S), 0:D]                    # 128-aligned lane offsets
        k = qkv_scr[pl.ds(row0, S), LANE:LANE + D]
        v = qkv_scr[pl.ds(row0, S), 2 * LANE:2 * LANE + D]
        scores = mm_nt(q, k) + psi                          # (S, S); q pre-scaled
        m = jnp.max(scores, axis=-1, keepdims=True)
        e = jnp.exp(scores - m)
        # exact reciprocal: denominator is only (S,1); keeps accuracy headroom for bf16
        attn = e / jnp.sum(e, axis=-1, keepdims=True)
        attn_scr[pl.ds(row0, S), :] = mm(attn, v)           # (S, D)
        return carry

    # fori_loop (not a Python unroll) so live ranges stay bounded as block_b grows.
    lax.fori_loop(0, bb, attn_body, 0, unroll=min(2, bb))

    # ---- residual + LayerNorm 1 (dropout = identity, eval mode) ----
    x = x_ref[...].reshape(bb * S, D)
    h1 = x + attn_scr[...]
    mu1 = jnp.mean(h1, axis=-1, keepdims=True)
    var1 = jnp.mean((h1 - mu1) ** 2, axis=-1, keepdims=True)
    h1n = (h1 - mu1) * lax.rsqrt(var1 + LN_EPS) * ln1_g_ref[...] + ln1_b_ref[...]

    # ---- FFN on the flattened slab ----
    f1 = jnp.maximum(mm(h1n, wf1_ref[...]) + bf1_ref[...], 0.0)
    f2 = mm(f1, wf2_ref[...]) + bf2_ref[...]

    # ---- residual + LayerNorm 2 ----
    h2 = h1n + f2
    mu2 = jnp.mean(h2, axis=-1, keepdims=True)
    var2 = jnp.mean((h2 - mu2) ** 2, axis=-1, keepdims=True)
    out = (h2 - mu2) * lax.rsqrt(var2 + LN_EPS) * ln2_g_ref[...] + ln2_b_ref[...]
    o_ref[...] = out.reshape(bb, S, D)


def pack_weights(params, compute_dtype=jnp.bfloat16):
    """One-time weight repacking (hoisted out of the per-call path)."""
    scale = float(D_MODEL) ** 0.5
    zpad = jnp.zeros((D_MODEL, LANE - D_MODEL), jnp.float32)
    # fused QKV weight, lane-aligned (q | 0 | k | 0 | v | 0); Wq pre-scaled by 1/sqrt(D)
    wqkv = jnp.concatenate(
        [params["wq_t"] / scale, zpad, params["wk_t"], zpad, params["wv_t"], zpad],
        axis=1)                                                       # (D, 3*LANE)

    # merge rot/trans/reflect MLPs over shared features [dist, sin, cos, dx, dy];
    # the reflect MLP's (-dx, -dy) columns are folded into its W1.
    rw1, rb1, rw2, _rb2 = params["rot"]
    tw1, tb1, tw2, _tb2 = params["trans"]
    fw1, fb1, fw2, _fb2 = params["reflect"]
    fw1_fold = jnp.stack([fw1[:, 0] - fw1[:, 2], fw1[:, 1] - fw1[:, 3]], axis=1)
    w1m = jnp.concatenate([
        jnp.concatenate([rw1, jnp.zeros((rw1.shape[0], 2), jnp.float32)], axis=1),
        jnp.concatenate([jnp.zeros((tw1.shape[0], 3), jnp.float32), tw1], axis=1),
        jnp.concatenate([jnp.zeros((fw1.shape[0], 3), jnp.float32), fw1_fold], axis=1),
    ], axis=0)                                                        # (H, 5)
    b1m = jnp.concatenate([rb1, tb1, fb1]).reshape(-1, 1)             # (H, 1)
    w2m = jnp.concatenate([rw2, tw2, fw2]).reshape(1, -1)             # (1, H)
    # b2 output biases add a constant to every score row -> cancel in softmax; dropped.

    return dict(
        wqkv=wqkv.astype(compute_dtype),
        w1m=w1m.astype(compute_dtype),
        b1m=b1m,                                  # f32, added to f32 accumulations
        w2m=w2m.astype(compute_dtype),
        ln1_g=params["ln1_g"], ln1_b=params["ln1_b"],
        wf1=params["wf1_t"].astype(compute_dtype), bf1=params["bf1"],
        wf2=params["wf2_t"].astype(compute_dtype), bf2=params["bf2"],
        ln2_g=params["ln2_g"], ln2_b=params["ln2_b"],
    )


def spatial_equivariant_encoder_layer(x, coords, packed, *,
                                      block_b=None, compute_dtype=jnp.bfloat16):
    B, S, D = x.shape
    assert D == D_MODEL and D <= LANE
    P = S * S

    if block_b is None:
        divs = [d for d in range(1, B + 1) if B % d == 0]
        # keep grid >= 2 (v7x has 2 TensorCores), cap the slab at bb*S <= 1024
        cands = [d for d in divs if d * S <= 1024 and (B // d) >= 2]
        if not cands:
            cands = [d for d in divs if d * S <= 1024] or [1]
        block_b = max(cands)
    assert B % block_b == 0
    grid = (B // block_b,)

    # lane-dense pairwise coordinate operands: pair index p = i*S + j
    cx, cy = coords[..., 0], coords[..., 1]                                  # (B, S)
    cj_flat = jnp.stack([jnp.tile(cx, (1, S)), jnp.tile(cy, (1, S))], axis=1)       # coords[j]
    ci_flat = jnp.stack([jnp.repeat(cx, S, axis=1), jnp.repeat(cy, S, axis=1)], axis=1)  # coords[i]

    kernel = functools.partial(_encoder_kernel, compute_dtype=compute_dtype)

    def rep(a):  # replicated (non-batched) operand: same whole-array block every grid step
        nd = a.ndim
        return pl.BlockSpec(a.shape, lambda g, _n=nd: (0,) * _n)

    weights = (packed["wqkv"], packed["w1m"], packed["b1m"], packed["w2m"],
               packed["ln1_g"], packed["ln1_b"],
               packed["wf1"], packed["bf1"], packed["wf2"], packed["bf2"],
               packed["ln2_g"], packed["ln2_b"])

    in_specs = [
        pl.BlockSpec((block_b, S, D), lambda g: (g, 0, 0)),   # x
        pl.BlockSpec((block_b, 2, P), lambda g: (g, 0, 0)),   # cj_flat
        pl.BlockSpec((block_b, 2, P), lambda g: (g, 0, 0)),   # ci_flat
    ] + [rep(w) for w in weights]
    out_specs = pl.BlockSpec((block_b, S, D), lambda g: (g, 0, 0))

    return pl.pallas_call(
        kernel,
        out_shape=jax.ShapeDtypeStruct((B, S, D), jnp.float32),
        grid_spec=pltpu.PrefetchScalarGridSpec(
            num_scalar_prefetch=0,
            grid=grid,
            in_specs=in_specs,
            out_specs=out_specs,
            scratch_shapes=[
                pltpu.VMEM((block_b * S, 3 * LANE), jnp.float32),   # fused QKV slab
                pltpu.VMEM((block_b * S, D), jnp.float32),          # attention output
            ],
        ),
        compiler_params=pltpu.CompilerParams(dimension_semantics=("parallel",)),
    )(x, cj_flat, ci_flat, *weights)


def init_params(key, d_model=D_MODEL, hidden=HIDDEN, ffn=FFN_DIM):
    ks = jax.random.split(key, 19)

    def w(k, shape, scale=0.1):
        return jax.random.normal(k, shape, jnp.float32) * scale

    return dict(
        # attention projection weights, stored transposed (in, out) so y = x @ W^T
        wq_t=w(ks[0], (d_model, d_model)),
        wk_t=w(ks[1], (d_model, d_model)),
        wv_t=w(ks[2], (d_model, d_model)),
        ln1_g=jnp.ones((1, d_model), jnp.float32),
        ln1_b=jnp.zeros((1, d_model), jnp.float32),
        wf1_t=w(ks[3], (d_model, ffn)),
        bf1=w(ks[4], (1, ffn)),
        wf2_t=w(ks[5], (ffn, d_model)),
        bf2=w(ks[6], (1, d_model)),
        ln2_g=jnp.ones((1, d_model), jnp.float32),
        ln2_b=jnp.zeros((1, d_model), jnp.float32),
        # each MLP: (W1 (H,F), b1 (H,), W2-row (H,), b2 (1,))
        rot=(w(ks[7], (hidden, 3)), w(ks[8], (hidden,)),
             w(ks[9], (hidden,)), w(ks[10], (1,))),
        trans=(w(ks[11], (hidden, 2)), w(ks[12], (hidden,)),
               w(ks[13], (hidden,)), w(ks[14], (1,))),
        reflect=(w(ks[15], (hidden, 4)), w(ks[16], (hidden,)),
                 w(ks[17], (hidden,)), w(ks[18], (1,))),
    )


def reference(x, coords, params):
    """Pure-JAX mirror of the PyTorch forward (eval mode), for validation."""
    def mlp(feat, w1, b1, w2, b2):
        h = jnp.maximum(jnp.einsum('...f,hf->...h', feat, w1) + b1, 0.0)
        return jnp.einsum('...h,h->...', h, w2) + b2[0]

    def ln(h, g, b):
        mu = jnp.mean(h, -1, keepdims=True)
        var = jnp.mean((h - mu) ** 2, -1, keepdims=True)
        return (h - mu) / jnp.sqrt(var + LN_EPS) * g + b

    B, S, D = x.shape
    q = x @ params["wq_t"]; k = x @ params["wk_t"]; v = x @ params["wv_t"]
    scores = jnp.einsum('bsd,btd->bst', q, k) / jnp.sqrt(jnp.float32(D))
    rel = coords[:, None, :, :] - coords[:, :, None, :]   # coords_j - coords_i
    dx, dy = rel[..., 0], rel[..., 1]
    distance = jnp.sqrt(dx ** 2 + dy ** 2 + 1e-8)
    theta = jnp.arctan2(dy, dx)
    psi_rot = mlp(jnp.stack([distance, jnp.sin(theta), jnp.cos(theta)], -1), *params["rot"])
    psi_trans = mlp(jnp.stack([dx, dy], -1), *params["trans"])
    psi_reflect = mlp(jnp.stack([dx, dy, -dx, -dy], -1), *params["reflect"])
    scores = scores + psi_rot + psi_trans + psi_reflect
    attn = jax.nn.softmax(scores, axis=-1)
    attn_out = jnp.einsum('bst,btd->bsd', attn, v)
    h1 = ln(x + attn_out, params["ln1_g"], params["ln1_b"])
    f = jnp.maximum(h1 @ params["wf1_t"] + params["bf1"], 0.0) @ params["wf2_t"] + params["bf2"]
    return ln(h1 + f, params["ln2_g"], params["ln2_b"])


if __name__ == "__main__":
    key = jax.random.PRNGKey(0)
    kx, kc, kp = jax.random.split(key, 3)
    B, S = 4, 16
    x = jax.random.normal(kx, (B, S, D_MODEL), jnp.float32)
    coords = jax.random.uniform(kc, (B, S, 2), jnp.float32, minval=-1.0, maxval=1.0)
    params = init_params(kp)
    ref = reference(x, coords, params)

    # default bf16 MXU path (rated matmul path on v5e/v6e/v7x; f32 accumulation)
    packed_bf16 = pack_weights(params, jnp.bfloat16)
    out = spatial_equivariant_encoder_layer(x, coords, packed_bf16,
                                            compute_dtype=jnp.bfloat16)
    out = jax.block_until_ready(out)
    assert out.shape == (B, S, D_MODEL)
    err_bf16 = float(jnp.max(jnp.abs(out - ref)))
    assert err_bf16 < 5e-2, f"bf16 max abs error too large: {err_bf16}"

    # f32 path for a tight numerical check of the kernel math
    packed_f32 = pack_weights(params, jnp.float32)
    out32 = jax.block_until_ready(
        spatial_equivariant_encoder_layer(x, coords, packed_f32,
                                          compute_dtype=jnp.float32))
    err_f32 = float(jnp.max(jnp.abs(out32 - ref)))
    assert err_f32 < 5e-3, f"f32 max abs error too large: {err_f32}"

    print("KERNEL_OK")
</pallas_src>

<mosaic_0001>
module attributes {stable_mosaic.version = 11 : i64} {
  func.func @_encoder_kernel(%arg0: i32, %arg1: memref<2x16x64xf32, #tpu.memory_space<vmem>>, %arg2: memref<2x2x256xf32, #tpu.memory_space<vmem>>, %arg3: memref<2x2x256xf32, #tpu.memory_space<vmem>>, %arg4: memref<64x384xbf16, #tpu.memory_space<vmem>>, %arg5: memref<96x5xbf16, #tpu.memory_space<vmem>>, %arg6: memref<96x1xf32, #tpu.memory_space<vmem>>, %arg7: memref<1x96xbf16, #tpu.memory_space<vmem>>, %arg8: memref<1x64xf32, #tpu.memory_space<vmem>>, %arg9: memref<1x64xf32, #tpu.memory_space<vmem>>, %arg10: memref<64x128xbf16, #tpu.memory_space<vmem>>, %arg11: memref<1x128xf32, #tpu.memory_space<vmem>>, %arg12: memref<128x64xbf16, #tpu.memory_space<vmem>>, %arg13: memref<1x64xf32, #tpu.memory_space<vmem>>, %arg14: memref<1x64xf32, #tpu.memory_space<vmem>>, %arg15: memref<1x64xf32, #tpu.memory_space<vmem>>, %arg16: memref<2x16x64xf32, #tpu.memory_space<vmem>>, %arg17: memref<32x384xf32, #tpu.memory_space<vmem>>, %arg18: memref<32x64xf32, #tpu.memory_space<vmem>>) attributes {dimension_semantics = [#tpu.dimension_semantics<parallel>], iteration_bounds = array<i64: 2>, scalar_prefetch = 0 : i64, scratch_operands = 2 : i64, tpu.core_type = #tpu.core_type<tc>, window_params = [{transform_indices = @transform_0, window_bounds = array<i64: 2, 16, 64>}, {transform_indices = @transform_1, window_bounds = array<i64: 2, 2, 256>}, {transform_indices = @transform_2, window_bounds = array<i64: 2, 2, 256>}, {pipeline_mode = #tpu.pipeline_mode<synchronous>, transform_indices = @transform_3, window_bounds = array<i64: 64, 384>}, {pipeline_mode = #tpu.pipeline_mode<synchronous>, transform_indices = @transform_4, window_bounds = array<i64: 96, 5>}, {pipeline_mode = #tpu.pipeline_mode<synchronous>, transform_indices = @transform_5, window_bounds = array<i64: 96, 1>}, {pipeline_mode = #tpu.pipeline_mode<synchronous>, transform_indices = @transform_6, window_bounds = array<i64: 1, 96>}, {pipeline_mode = #tpu.pipeline_mode<synchronous>, transform_indices = @transform_7, window_bounds = array<i64: 1, 64>}, {pipeline_mode = #tpu.pipeline_mode<synchronous>, transform_indices = @transform_8, window_bounds = array<i64: 1, 64>}, {pipeline_mode = #tpu.pipeline_mode<synchronous>, transform_indices = @transform_9, window_bounds = array<i64: 64, 128>}, {pipeline_mode = #tpu.pipeline_mode<synchronous>, transform_indices = @transform_10, window_bounds = array<i64: 1, 128>}, {pipeline_mode = #tpu.pipeline_mode<synchronous>, transform_indices = @transform_11, window_bounds = array<i64: 128, 64>}, {pipeline_mode = #tpu.pipeline_mode<synchronous>, transform_indices = @transform_12, window_bounds = array<i64: 1, 64>}, {pipeline_mode = #tpu.pipeline_mode<synchronous>, transform_indices = @transform_13, window_bounds = array<i64: 1, 64>}, {pipeline_mode = #tpu.pipeline_mode<synchronous>, transform_indices = @transform_14, window_bounds = array<i64: 1, 64>}, {transform_indices = @transform_15, window_bounds = array<i64: 2, 16, 64>}]} {
    %c0 = arith.constant 0 : index
    %c0_0 = arith.constant 0 : index
    %c0_1 = arith.constant 0 : index
    %0 = vector.load %arg1[%c0, %c0_0, %c0_1] : memref<2x16x64xf32, #tpu.memory_space<vmem>>, vector<2x16x64xf32>
    %1 = vector.shape_cast %0 : vector<2x16x64xf32> to vector<32x64xf32>
    %c0_2 = arith.constant 0 : index
    %c0_3 = arith.constant 0 : index
    %2 = vector.load %arg4[%c0_2, %c0_3] : memref<64x384xbf16, #tpu.memory_space<vmem>>, vector<64x384xbf16>
    %3 = arith.truncf %1 : vector<32x64xf32> to vector<32x64xbf16>
    %cst = arith.constant dense<0.000000e+00> : vector<32x384xf32>
    %4 = tpu.matmul %3, %2, %cst {dimension_numbers = #tpu.dot_dimension_numbers<[1], [0], [0], [1], [0, 0, 1, 1], [], []>} : vector<32x64xbf16>, vector<64x384xbf16>, vector<32x384xf32> -> vector<32x384xf32>
    %c0_4 = arith.constant 0 : index
    %c0_5 = arith.constant 0 : index
    %5 = vector.load %arg17[%c0_4, %c0_5] : memref<32x384xf32, #tpu.memory_space<vmem>>, vector<32x384xf32>
    tpu.vector_store %arg17[%c0_4, %c0_5], %4 {strides = array<i32>} : memref<32x384xf32, #tpu.memory_space<vmem>>, vector<32x384xf32>,
    %c0_6 = arith.constant 0 : index
    %c0_7 = arith.constant 0 : index
    %6 = vector.load %arg5[%c0_6, %c0_7] : memref<96x5xbf16, #tpu.memory_space<vmem>>, vector<96x5xbf16>
    %c0_8 = arith.constant 0 : index
    %c0_9 = arith.constant 0 : index
    %7 = vector.load %arg6[%c0_8, %c0_9] : memref<96x1xf32, #tpu.memory_space<vmem>>, vector<96x1xf32>
    %c0_10 = arith.constant 0 : index
    %c0_11 = arith.constant 0 : index
    %8 = vector.load %arg7[%c0_10, %c0_11] : memref<1x96xbf16, #tpu.memory_space<vmem>>, vector<1x96xbf16>
    %c0_i32 = arith.constant 0 : i32
    %9 = arith.index_cast %c0_i32 : i32 to index
    %c0_12 = arith.constant 0 : index
    %c0_13 = arith.constant 0 : index
    %10 = vector.load %arg2[%9, %c0_12, %c0_13] : memref<2x2x256xf32, #tpu.memory_space<vmem>>, vector<1x2x256xf32>
    %11 = vector.shape_cast %10 : vector<1x2x256xf32> to vector<2x256xf32>
    %12 = arith.index_cast %c0_i32 : i32 to index
    %c0_14 = arith.constant 0 : index
    %c0_15 = arith.constant 0 : index
    %13 = vector.load %arg3[%12, %c0_14, %c0_15] : memref<2x2x256xf32, #tpu.memory_space<vmem>>, vector<1x2x256xf32>
    %14 = vector.shape_cast %13 : vector<1x2x256xf32> to vector<2x256xf32>
    %15 = arith.subf %11, %14 : vector<2x256xf32>
    %16 = vector.extract_strided_slice %15 {offsets = [0, 0], sizes = [1, 256], strides = [1, 1]} : vector<2x256xf32> to vector<1x256xf32>
    %17 = vector.extract_strided_slice %15 {offsets = [1, 0], sizes = [1, 256], strides = [1, 1]} : vector<2x256xf32> to vector<1x256xf32>
    %18 = arith.mulf %16, %16 : vector<1x256xf32>
    %19 = arith.mulf %17, %17 : vector<1x256xf32>
    %20 = arith.addf %18, %19 : vector<1x256xf32>
    %cst_16 = arith.constant 9.99999993E-9 : f32
    %21 = vector.broadcast %cst_16 : f32 to vector<1x256xf32>
    %22 = arith.addf %20, %21 : vector<1x256xf32>
    %23 = math.sqrt %22 : vector<1x256xf32>
    %cst_17 = arith.constant 0.000000e+00 : f32
    %24 = vector.broadcast %cst_17 : f32 to vector<1x256xf32>
    %25 = arith.cmpf ogt, %20, %24 : vector<1x256xf32>
    %cst_18 = arith.constant 1.000000e+00 : f32
    %26 = vector.broadcast %cst_18 : f32 to vector<1x256xf32>
    %27 = arith.select %25, %20, %26 : vector<1x256xi1>, vector<1x256xf32>
    %28 = math.rsqrt %27 : vector<1x256xf32>
    %29 = arith.mulf %17, %28 : vector<1x256xf32>
    %cst_19 = arith.constant 0.000000e+00 : f32
    %30 = vector.broadcast %cst_19 : f32 to vector<1x256xf32>
    %31 = arith.select %25, %29, %30 : vector<1x256xi1>, vector<1x256xf32>
    %32 = arith.mulf %16, %28 : vector<1x256xf32>
    %cst_20 = arith.constant 1.000000e+00 : f32
    %33 = vector.broadcast %cst_20 : f32 to vector<1x256xf32>
    %34 = arith.select %25, %32, %33 : vector<1x256xi1>, vector<1x256xf32>
    %35 = tpu.concatenate %23, %31, %34, %16, %17 in 0 : vector<1x256xf32>, vector<1x256xf32>, vector<1x256xf32>, vector<1x256xf32>, vector<1x256xf32> -> vector<5x256xf32>
    %36 = arith.truncf %35 : vector<5x256xf32> to vector<5x256xbf16>
    %cst_21 = arith.constant dense<0.000000e+00> : vector<96x256xf32>
    %37 = tpu.matmul %6, %36, %cst_21 {dimension_numbers = #tpu.dot_dimension_numbers<[1], [0], [0], [1], [0, 0, 1, 1], [], []>} : vector<96x5xbf16>, vector<5x256xbf16>, vector<96x256xf32> -> vector<96x256xf32>
    %38 = vector.broadcast %7 : vector<96x1xf32> to vector<96x256xf32>
    %39 = arith.addf %37, %38 : vector<96x256xf32>
    %cst_22 = arith.constant 0.000000e+00 : f32
    %40 = vector.broadcast %cst_22 : f32 to vector<96x256xf32>
    %41 = arith.maximumf %39, %40 : vector<96x256xf32>
    %42 = arith.truncf %41 : vector<96x256xf32> to vector<96x256xbf16>
    %cst_23 = arith.constant dense<0.000000e+00> : vector<1x256xf32>
    %43 = tpu.matmul %8, %42, %cst_23 {dimension_numbers = #tpu.dot_dimension_numbers<[1], [0], [0], [1], [0, 0, 1, 1], [], []>} : vector<1x96xbf16>, vector<96x256xbf16>, vector<1x256xf32> -> vector<1x256xf32>
    %44 = vector.extract_strided_slice %43 {offsets = [0, 0], sizes = [1, 16], strides = [1, 1]} : vector<1x256xf32> to vector<1x16xf32>
    %45 = vector.extract_strided_slice %43 {offsets = [0, 16], sizes = [1, 16], strides = [1, 1]} : vector<1x256xf32> to vector<1x16xf32>
    %46 = vector.extract_strided_slice %43 {offsets = [0, 32], sizes = [1, 16], strides = [1, 1]} : vector<1x256xf32> to vector<1x16xf32>
    %47 = vector.extract_strided_slice %43 {offsets = [0, 48], sizes = [1, 16], strides = [1, 1]} : vector<1x256xf32> to vector<1x16xf32>
    %48 = vector.extract_strided_slice %43 {offsets = [0, 64], sizes = [1, 16], strides = [1, 1]} : vector<1x256xf32> to vector<1x16xf32>
    %49 = vector.extract_strided_slice %43 {offsets = [0, 80], sizes = [1, 16], strides = [1, 1]} : vector<1x256xf32> to vector<1x16xf32>
    %50 = vector.extract_strided_slice %43 {offsets = [0, 96], sizes = [1, 16], strides = [1, 1]} : vector<1x256xf32> to vector<1x16xf32>
    %51 = vector.extract_strided_slice %43 {offsets = [0, 112], sizes = [1, 16], strides = [1, 1]} : vector<1x256xf32> to vector<1x16xf32>
    %52 = vector.extract_strided_slice %43 {offsets = [0, 128], sizes = [1, 16], strides = [1, 1]} : vector<1x256xf32> to vector<1x16xf32>
    %53 = vector.extract_strided_slice %43 {offsets = [0, 144], sizes = [1, 16], strides = [1, 1]} : vector<1x256xf32> to vector<1x16xf32>
    %54 = vector.extract_strided_slice %43 {offsets = [0, 160], sizes = [1, 16], strides = [1, 1]} : vector<1x256xf32> to vector<1x16xf32>
    %55 = vector.extract_strided_slice %43 {offsets = [0, 176], sizes = [1, 16], strides = [1, 1]} : vector<1x256xf32> to vector<1x16xf32>
    %56 = vector.extract_strided_slice %43 {offsets = [0, 192], sizes = [1, 16], strides = [1, 1]} : vector<1x256xf32> to vector<1x16xf32>
    %57 = vector.extract_strided_slice %43 {offsets = [0, 208], sizes = [1, 16], strides = [1, 1]} : vector<1x256xf32> to vector<1x16xf32>
    %58 = vector.extract_strided_slice %43 {offsets = [0, 224], sizes = [1, 16], strides = [1, 1]} : vector<1x256xf32> to vector<1x16xf32>
    %59 = vector.extract_strided_slice %43 {offsets = [0, 240], sizes = [1, 16], strides = [1, 1]} : vector<1x256xf32> to vector<1x16xf32>
    %60 = tpu.concatenate %44, %45, %46, %47, %48, %49, %50, %51, %52, %53, %54, %55, %56, %57, %58, %59 in 0 : vector<1x16xf32>, vector<1x16xf32>, vector<1x16xf32>, vector<1x16xf32>, vector<1x16xf32>, vector<1x16xf32>, vector<1x16xf32>, vector<1x16xf32>, vector<1x16xf32>, vector<1x16xf32>, vector<1x16xf32>, vector<1x16xf32>, vector<1x16xf32>, vector<1x16xf32>, vector<1x16xf32>, vector<1x16xf32> -> vector<16x16xf32>
    %c16_i32 = arith.constant 16 : i32
    %61 = arith.muli %c0_i32, %c16_i32 : i32
    %62 = tpu.assume_multiple %61, 16 : i32
    %63 = arith.index_cast %62 : i32 to index
    %c0_24 = arith.constant 0 : index
    %64 = vector.load %arg17[%63, %c0_24] : memref<32x384xf32, #tpu.memory_space<vmem>>, vector<16x64xf32>
    %65 = arith.index_cast %62 : i32 to index
    %c128 = arith.constant 128 : index
    %66 = vector.load %arg17[%65, %c128] : memref<32x384xf32, #tpu.memory_space<vmem>>, vector<16x64xf32>
    %67 = arith.index_cast %62 : i32 to index
    %c256 = arith.constant 256 : index
    %68 = vector.load %arg17[%67, %c256] : memref<32x384xf32, #tpu.memory_space<vmem>>, vector<16x64xf32>
    %69 = arith.truncf %64 : vector<16x64xf32> to vector<16x64xbf16>
    %70 = arith.truncf %66 : vector<16x64xf32> to vector<16x64xbf16>
    %cst_25 = arith.constant dense<0.000000e+00> : vector<16x16xf32>
    %71 = tpu.matmul %69, %70, %cst_25 {dimension_numbers = #tpu.dot_dimension_numbers<[1], [1], [0], [0], [0, 0, 1, 0], [], []>} : vector<16x64xbf16>, vector<16x64xbf16>, vector<16x16xf32> -> vector<16x16xf32>
    %72 = arith.addf %71, %60 : vector<16x16xf32>
    %cst_26 = arith.constant dense<0xFF800000> : vector<16xf32>
    %73 = vector.multi_reduction <maximumf>, %72, %cst_26 [1] : vector<16x16xf32> to vector<16xf32>
    %74 = vector.shape_cast %73 : vector<16xf32> to vector<16x1xf32>
    %75 = vector.broadcast %74 : vector<16x1xf32> to vector<16x16xf32>
    %76 = arith.subf %72, %75 : vector<16x16xf32>
    %77 = math.exp %76 : vector<16x16xf32>
    %cst_27 = arith.constant dense<0.000000e+00> : vector<16xf32>
    %78 = vector.multi_reduction <add>, %77, %cst_27 [1] : vector<16x16xf32> to vector<16xf32>
    %79 = vector.shape_cast %78 : vector<16xf32> to vector<16x1xf32>
    %80 = vector.broadcast %79 : vector<16x1xf32> to vector<16x16xf32>
    %81 = arith.divf %77, %80 : vector<16x16xf32>
    %82 = arith.truncf %81 : vector<16x16xf32> to vector<16x16xbf16>
    %83 = arith.truncf %68 : vector<16x64xf32> to vector<16x64xbf16>
    %cst_28 = arith.constant dense<0.000000e+00> : vector<16x64xf32>
    %84 = tpu.matmul %82, %83, %cst_28 {dimension_numbers = #tpu.dot_dimension_numbers<[1], [0], [0], [1], [0, 0, 1, 1], [], []>} : vector<16x16xbf16>, vector<16x64xbf16>, vector<16x64xf32> -> vector<16x64xf32>
    %85 = arith.index_cast %62 : i32 to index
    %c0_29 = arith.constant 0 : index
    %86 = vector.load %arg18[%85, %c0_29] : memref<32x64xf32, #tpu.memory_space<vmem>>, vector<16x64xf32>
    tpu.vector_store %arg18[%85, %c0_29], %84 {strides = array<i32>} : memref<32x64xf32, #tpu.memory_space<vmem>>, vector<16x64xf32>,
    %c1_i32 = arith.constant 1 : i32
    %87 = arith.index_cast %c1_i32 : i32 to index
    %c0_30 = arith.constant 0 : index
    %c0_31 = arith.constant 0 : index
    %88 = vector.load %arg2[%87, %c0_30, %c0_31] : memref<2x2x256xf32, #tpu.memory_space<vmem>>, vector<1x2x256xf32>
    %89 = vector.shape_cast %88 : vector<1x2x256xf32> to vector<2x256xf32>
    %90 = arith.index_cast %c1_i32 : i32 to index
    %c0_32 = arith.constant 0 : index
    %c0_33 = arith.constant 0 : index
    %91 = vector.load %arg3[%90, %c0_32, %c0_33] : memref<2x2x256xf32, #tpu.memory_space<vmem>>, vector<1x2x256xf32>
    %92 = vector.shape_cast %91 : vector<1x2x256xf32> to vector<2x256xf32>
    %93 = arith.subf %89, %92 : vector<2x256xf32>
    %94 = vector.extract_strided_slice %93 {offsets = [0, 0], sizes = [1, 256], strides = [1, 1]} : vector<2x256xf32> to vector<1x256xf32>
    %95 = vector.extract_strided_slice %93 {offsets = [1, 0], sizes = [1, 256], strides = [1, 1]} : vector<2x256xf32> to vector<1x256xf32>
    %96 = arith.mulf %94, %94 : vector<1x256xf32>
    %97 = arith.mulf %95, %95 : vector<1x256xf32>
    %98 = arith.addf %96, %97 : vector<1x256xf32>
    %cst_34 = arith.constant 9.99999993E-9 : f32
    %99 = vector.broadcast %cst_34 : f32 to vector<1x256xf32>
    %100 = arith.addf %98, %99 : vector<1x256xf32>
    %101 = math.sqrt %100 : vector<1x256xf32>
    %cst_35 = arith.constant 0.000000e+00 : f32
    %102 = vector.broadcast %cst_35 : f32 to vector<1x256xf32>
    %103 = arith.cmpf ogt, %98, %102 : vector<1x256xf32>
    %cst_36 = arith.constant 1.000000e+00 : f32
    %104 = vector.broadcast %cst_36 : f32 to vector<1x256xf32>
    %105 = arith.select %103, %98, %104 : vector<1x256xi1>, vector<1x256xf32>
    %106 = math.rsqrt %105 : vector<1x256xf32>
    %107 = arith.mulf %95, %106 : vector<1x256xf32>
    %cst_37 = arith.constant 0.000000e+00 : f32
    %108 = vector.broadcast %cst_37 : f32 to vector<1x256xf32>
    %109 = arith.select %103, %107, %108 : vector<1x256xi1>, vector<1x256xf32>
    %110 = arith.mulf %94, %106 : vector<1x256xf32>
    %cst_38 = arith.constant 1.000000e+00 : f32
    %111 = vector.broadcast %cst_38 : f32 to vector<1x256xf32>
    %112 = arith.select %103, %110, %111 : vector<1x256xi1>, vector<1x256xf32>
    %113 = tpu.concatenate %101, %109, %112, %94, %95 in 0 : vector<1x256xf32>, vector<1x256xf32>, vector<1x256xf32>, vector<1x256xf32>, vector<1x256xf32> -> vector<5x256xf32>
    %114 = arith.truncf %113 : vector<5x256xf32> to vector<5x256xbf16>
    %cst_39 = arith.constant dense<0.000000e+00> : vector<96x256xf32>
    %115 = tpu.matmul %6, %114, %cst_39 {dimension_numbers = #tpu.dot_dimension_numbers<[1], [0], [0], [1], [0, 0, 1, 1], [], []>} : vector<96x5xbf16>, vector<5x256xbf16>, vector<96x256xf32> -> vector<96x256xf32>
    %116 = vector.broadcast %7 : vector<96x1xf32> to vector<96x256xf32>
    %117 = arith.addf %115, %116 : vector<96x256xf32>
    %cst_40 = arith.constant 0.000000e+00 : f32
    %118 = vector.broadcast %cst_40 : f32 to vector<96x256xf32>
    %119 = arith.maximumf %117, %118 : vector<96x256xf32>
    %120 = arith.truncf %119 : vector<96x256xf32> to vector<96x256xbf16>
    %cst_41 = arith.constant dense<0.000000e+00> : vector<1x256xf32>
    %121 = tpu.matmul %8, %120, %cst_41 {dimension_numbers = #tpu.dot_dimension_numbers<[1], [0], [0], [1], [0, 0, 1, 1], [], []>} : vector<1x96xbf16>, vector<96x256xbf16>, vector<1x256xf32> -> vector<1x256xf32>
    %122 = vector.extract_strided_slice %121 {offsets = [0, 0], sizes = [1, 16], strides = [1, 1]} : vector<1x256xf32> to vector<1x16xf32>
    %123 = vector.extract_strided_slice %121 {offsets = [0, 16], sizes = [1, 16], strides = [1, 1]} : vector<1x256xf32> to vector<1x16xf32>
    %124 = vector.extract_strided_slice %121 {offsets = [0, 32], sizes = [1, 16], strides = [1, 1]} : vector<1x256xf32> to vector<1x16xf32>
    %125 = vector.extract_strided_slice %121 {offsets = [0, 48], sizes = [1, 16], strides = [1, 1]} : vector<1x256xf32> to vector<1x16xf32>
    %126 = vector.extract_strided_slice %121 {offsets = [0, 64], sizes = [1, 16], strides = [1, 1]} : vector<1x256xf32> to vector<1x16xf32>
    %127 = vector.extract_strided_slice %121 {offsets = [0, 80], sizes = [1, 16], strides = [1, 1]} : vector<1x256xf32> to vector<1x16xf32>
    %128 = vector.extract_strided_slice %121 {offsets = [0, 96], sizes = [1, 16], strides = [1, 1]} : vector<1x256xf32> to vector<1x16xf32>
    %129 = vector.extract_strided_slice %121 {offsets = [0, 112], sizes = [1, 16], strides = [1, 1]} : vector<1x256xf32> to vector<1x16xf32>
    %130 = vector.extract_strided_slice %121 {offsets = [0, 128], sizes = [1, 16], strides = [1, 1]} : vector<1x256xf32> to vector<1x16xf32>
    %131 = vector.extract_strided_slice %121 {offsets = [0, 144], sizes = [1, 16], strides = [1, 1]} : vector<1x256xf32> to vector<1x16xf32>
    %132 = vector.extract_strided_slice %121 {offsets = [0, 160], sizes = [1, 16], strides = [1, 1]} : vector<1x256xf32> to vector<1x16xf32>
    %133 = vector.extract_strided_slice %121 {offsets = [0, 176], sizes = [1, 16], strides = [1, 1]} : vector<1x256xf32> to vector<1x16xf32>
    %134 = vector.extract_strided_slice %121 {offsets = [0, 192], sizes = [1, 16], strides = [1, 1]} : vector<1x256xf32> to vector<1x16xf32>
    %135 = vector.extract_strided_slice %121 {offsets = [0, 208], sizes = [1, 16], strides = [1, 1]} : vector<1x256xf32> to vector<1x16xf32>
    %136 = vector.extract_strided_slice %121 {offsets = [0, 224], sizes = [1, 16], strides = [1, 1]} : vector<1x256xf32> to vector<1x16xf32>
    %137 = vector.extract_strided_slice %121 {offsets = [0, 240], sizes = [1, 16], strides = [1, 1]} : vector<1x256xf32> to vector<1x16xf32>
    %138 = tpu.concatenate %122, %123, %124, %125, %126, %127, %128, %129, %130, %131, %132, %133, %134, %135, %136, %137 in 0 : vector<1x16xf32>, vector<1x16xf32>, vector<1x16xf32>, vector<1x16xf32>, vector<1x16xf32>, vector<1x16xf32>, vector<1x16xf32>, vector<1x16xf32>, vector<1x16xf32>, vector<1x16xf32>, vector<1x16xf32>, vector<1x16xf32>, vector<1x16xf32>, vector<1x16xf32>, vector<1x16xf32>, vector<1x16xf32> -> vector<16x16xf32>
    %c16_i32_42 = arith.constant 16 : i32
    %139 = arith.muli %c1_i32, %c16_i32_42 : i32
    %140 = tpu.assume_multiple %139, 16 : i32
    %141 = arith.index_cast %140 : i32 to index
    %c0_43 = arith.constant 0 : index
    %142 = vector.load %arg17[%141, %c0_43] : memref<32x384xf32, #tpu.memory_space<vmem>>, vector<16x64xf32>
    %143 = arith.index_cast %140 : i32 to index
    %c128_44 = arith.constant 128 : index
    %144 = vector.load %arg17[%143, %c128_44] : memref<32x384xf32, #tpu.memory_space<vmem>>, vector<16x64xf32>
    %145 = arith.index_cast %140 : i32 to index
    %c256_45 = arith.constant 256 : index
    %146 = vector.load %arg17[%145, %c256_45] : memref<32x384xf32, #tpu.memory_space<vmem>>, vector<16x64xf32>
    %147 = arith.truncf %142 : vector<16x64xf32> to vector<16x64xbf16>
    %148 = arith.truncf %144 : vector<16x64xf32> to vector<16x64xbf16>
    %cst_46 = arith.constant dense<0.000000e+00> : vector<16x16xf32>
    %149 = tpu.matmul %147, %148, %cst_46 {dimension_numbers = #tpu.dot_dimension_numbers<[1], [1], [0], [0], [0, 0, 1, 0], [], []>} : vector<16x64xbf16>, vector<16x64xbf16>, vector<16x16xf32> -> vector<16x16xf32>
    %150 = arith.addf %149, %138 : vector<16x16xf32>
    %cst_47 = arith.constant dense<0xFF800000> : vector<16xf32>
    %151 = vector.multi_reduction <maximumf>, %150, %cst_47 [1] : vector<16x16xf32> to vector<16xf32>
    %152 = vector.shape_cast %151 : vector<16xf32> to vector<16x1xf32>
    %153 = vector.broadcast %152 : vector<16x1xf32> to vector<16x16xf32>
    %154 = arith.subf %150, %153 : vector<16x16xf32>
    %155 = math.exp %154 : vector<16x16xf32>
    %cst_48 = arith.constant dense<0.000000e+00> : vector<16xf32>
    %156 = vector.multi_reduction <add>, %155, %cst_48 [1] : vector<16x16xf32> to vector<16xf32>
    %157 = vector.shape_cast %156 : vector<16xf32> to vector<16x1xf32>
    %158 = vector.broadcast %157 : vector<16x1xf32> to vector<16x16xf32>
    %159 = arith.divf %155, %158 : vector<16x16xf32>
    %160 = arith.truncf %159 : vector<16x16xf32> to vector<16x16xbf16>
    %161 = arith.truncf %146 : vector<16x64xf32> to vector<16x64xbf16>
    %cst_49 = arith.constant dense<0.000000e+00> : vector<16x64xf32>
    %162 = tpu.matmul %160, %161, %cst_49 {dimension_numbers = #tpu.dot_dimension_numbers<[1], [0], [0], [1], [0, 0, 1, 1], [], []>} : vector<16x16xbf16>, vector<16x64xbf16>, vector<16x64xf32> -> vector<16x64xf32>
    %163 = arith.index_cast %140 : i32 to index
    %c0_50 = arith.constant 0 : index
    %164 = vector.load %arg18[%163, %c0_50] : memref<32x64xf32, #tpu.memory_space<vmem>>, vector<16x64xf32>
    tpu.vector_store %arg18[%163, %c0_50], %162 {strides = array<i32>} : memref<32x64xf32, #tpu.memory_space<vmem>>, vector<16x64xf32>,
    %c2_i32 = arith.constant 2 : i32
    %c0_51 = arith.constant 0 : index
    %c0_52 = arith.constant 0 : index
    %c0_53 = arith.constant 0 : index
    %165 = vector.load %arg1[%c0_51, %c0_52, %c0_53] : memref<2x16x64xf32, #tpu.memory_space<vmem>>, vector<2x16x64xf32>
    %166 = vector.shape_cast %165 : vector<2x16x64xf32> to vector<32x64xf32>
    %c0_54 = arith.constant 0 : index
    %c0_55 = arith.constant 0 : index
    %167 = vector.load %arg18[%c0_54, %c0_55] : memref<32x64xf32, #tpu.memory_space<vmem>>, vector<32x64xf32>
    %168 = arith.addf %166, %167 : vector<32x64xf32>
    %cst_56 = arith.constant dense<0.000000e+00> : vector<32xf32>
    %169 = vector.multi_reduction <add>, %168, %cst_56 [1] : vector<32x64xf32> to vector<32xf32>
    %170 = vector.shape_cast %169 : vector<32xf32> to vector<32x1xf32>
    %cst_57 = arith.constant 6.400000e+01 : f32
    %171 = vector.broadcast %cst_57 : f32 to vector<32x1xf32>
    %172 = arith.divf %170, %171 : vector<32x1xf32>
    %173 = vector.broadcast %172 : vector<32x1xf32> to vector<32x64xf32>
    %174 = arith.subf %168, %173 : vector<32x64xf32>
    %175 = arith.mulf %174, %174 : vector<32x64xf32>
    %cst_58 = arith.constant dense<0.000000e+00> : vector<32xf32>
    %176 = vector.multi_reduction <add>, %175, %cst_58 [1] : vector<32x64xf32> to vector<32xf32>
    %177 = vector.shape_cast %176 : vector<32xf32> to vector<32x1xf32>
    %cst_59 = arith.constant 6.400000e+01 : f32
    %178 = vector.broadcast %cst_59 : f32 to vector<32x1xf32>
    %179 = arith.divf %177, %178 : vector<32x1xf32>
    %180 = vector.broadcast %172 : vector<32x1xf32> to vector<32x64xf32>
    %181 = arith.subf %168, %180 : vector<32x64xf32>
    %cst_60 = arith.constant 9.99999974E-6 : f32
    %182 = vector.broadcast %cst_60 : f32 to vector<32x1xf32>
    %183 = arith.addf %179, %182 : vector<32x1xf32>
    %184 = math.rsqrt %183 : vector<32x1xf32>
    %185 = vector.broadcast %184 : vector<32x1xf32> to vector<32x64xf32>
    %186 = arith.mulf %181, %185 : vector<32x64xf32>
    %c0_61 = arith.constant 0 : index
    %c0_62 = arith.constant 0 : index
    %187 = vector.load %arg8[%c0_61, %c0_62] : memref<1x64xf32, #tpu.memory_space<vmem>>, vector<1x64xf32>
    %188 = vector.broadcast %187 : vector<1x64xf32> to vector<32x64xf32>
    %189 = arith.mulf %186, %188 : vector<32x64xf32>
    %c0_63 = arith.constant 0 : index
    %c0_64 = arith.constant 0 : index
    %190 = vector.load %arg9[%c0_63, %c0_64] : memref<1x64xf32, #tpu.memory_space<vmem>>, vector<1x64xf32>
    %191 = vector.broadcast %190 : vector<1x64xf32> to vector<32x64xf32>
    %192 = arith.addf %189, %191 : vector<32x64xf32>
    %c0_65 = arith.constant 0 : index
    %c0_66 = arith.constant 0 : index
    %193 = vector.load %arg10[%c0_65, %c0_66] : memref<64x128xbf16, #tpu.memory_space<vmem>>, vector<64x128xbf16>
    %194 = arith.truncf %192 : vector<32x64xf32> to vector<32x64xbf16>
    %cst_67 = arith.constant dense<0.000000e+00> : vector<32x128xf32>
    %195 = tpu.matmul %194, %193, %cst_67 {dimension_numbers = #tpu.dot_dimension_numbers<[1], [0], [0], [1], [0, 0, 1, 1], [], []>} : vector<32x64xbf16>, vector<64x128xbf16>, vector<32x128xf32> -> vector<32x128xf32>
    %c0_68 = arith.constant 0 : index
    %c0_69 = arith.constant 0 : index
    %196 = vector.load %arg11[%c0_68, %c0_69] : memref<1x128xf32, #tpu.memory_space<vmem>>, vector<1x128xf32>
    %197 = vector.broadcast %196 : vector<1x128xf32> to vector<32x128xf32>
    %198 = arith.addf %195, %197 : vector<32x128xf32>
    %cst_70 = arith.constant 0.000000e+00 : f32
    %199 = vector.broadcast %cst_70 : f32 to vector<32x128xf32>
    %200 = arith.maximumf %198, %199 : vector<32x128xf32>
    %c0_71 = arith.constant 0 : index
    %c0_72 = arith.constant 0 : index
    %201 = vector.load %arg12[%c0_71, %c0_72] : memref<128x64xbf16, #tpu.memory_space<vmem>>, vector<128x64xbf16>
    %202 = arith.truncf %200 : vector<32x128xf32> to vector<32x128xbf16>
    %cst_73 = arith.constant dense<0.000000e+00> : vector<32x64xf32>
    %203 = tpu.matmul %202, %201, %cst_73 {dimension_numbers = #tpu.dot_dimension_numbers<[1], [0], [0], [1], [0, 0, 1, 1], [], []>} : vector<32x128xbf16>, vector<128x64xbf16>, vector<32x64xf32> -> vector<32x64xf32>
    %c0_74 = arith.constant 0 : index
    %c0_75 = arith.constant 0 : index
    %204 = vector.load %arg13[%c0_74, %c0_75] : memref<1x64xf32, #tpu.memory_space<vmem>>, vector<1x64xf32>
    %205 = vector.broadcast %204 : vector<1x64xf32> to vector<32x64xf32>
    %206 = arith.addf %203, %205 : vector<32x64xf32>
    %207 = arith.addf %192, %206 : vector<32x64xf32>
    %cst_76 = arith.constant dense<0.000000e+00> : vector<32xf32>
    %208 = vector.multi_reduction <add>, %207, %cst_76 [1] : vector<32x64xf32> to vector<32xf32>
    %209 = vector.shape_cast %208 : vector<32xf32> to vector<32x1xf32>
    %cst_77 = arith.constant 6.400000e+01 : f32
    %210 = vector.broadcast %cst_77 : f32 to vector<32x1xf32>
    %211 = arith.divf %209, %210 : vector<32x1xf32>
    %212 = vector.broadcast %211 : vector<32x1xf32> to vector<32x64xf32>
    %213 = arith.subf %207, %212 : vector<32x64xf32>
    %214 = arith.mulf %213, %213 : vector<32x64xf32>
    %cst_78 = arith.constant dense<0.000000e+00> : vector<32xf32>
    %215 = vector.multi_reduction <add>, %214, %cst_78 [1] : vector<32x64xf32> to vector<32xf32>
    %216 = vector.shape_cast %215 : vector<32xf32> to vector<32x1xf32>
    %cst_79 = arith.constant 6.400000e+01 : f32
    %217 = vector.broadcast %cst_79 : f32 to vector<32x1xf32>
    %218 = arith.divf %216, %217 : vector<32x1xf32>
    %219 = vector.broadcast %211 : vector<32x1xf32> to vector<32x64xf32>
    %220 = arith.subf %207, %219 : vector<32x64xf32>
    %cst_80 = arith.constant 9.99999974E-6 : f32
    %221 = vector.broadcast %cst_80 : f32 to vector<32x1xf32>
    %222 = arith.addf %218, %221 : vector<32x1xf32>
    %223 = math.rsqrt %222 : vector<32x1xf32>
    %224 = vector.broadcast %223 : vector<32x1xf32> to vector<32x64xf32>
    %225 = arith.mulf %220, %224 : vector<32x64xf32>
    %c0_81 = arith.constant 0 : index
    %c0_82 = arith.constant 0 : index
    %226 = vector.load %arg14[%c0_81, %c0_82] : memref<1x64xf32, #tpu.memory_space<vmem>>, vector<1x64xf32>
    %227 = vector.broadcast %226 : vector<1x64xf32> to vector<32x64xf32>
    %228 = arith.mulf %225, %227 : vector<32x64xf32>
    %c0_83 = arith.constant 0 : index
    %c0_84 = arith.constant 0 : index
    %229 = vector.load %arg15[%c0_83, %c0_84] : memref<1x64xf32, #tpu.memory_space<vmem>>, vector<1x64xf32>
    %230 = vector.broadcast %229 : vector<1x64xf32> to vector<32x64xf32>
    %231 = arith.addf %228, %230 : vector<32x64xf32>
    %232 = vector.shape_cast %231 : vector<32x64xf32> to vector<2x16x64xf32>
    %c0_85 = arith.constant 0 : index
    %c0_86 = arith.constant 0 : index
    %c0_87 = arith.constant 0 : index
    %233 = vector.load %arg16[%c0_85, %c0_86, %c0_87] : memref<2x16x64xf32, #tpu.memory_space<vmem>>, vector<2x16x64xf32>
    tpu.vector_store %arg16[%c0_85, %c0_86, %c0_87], %232 {strides = array<i32>} : memref<2x16x64xf32, #tpu.memory_space<vmem>>, vector<2x16x64xf32>,
    return
  }
  func.func @transform_0(%arg0: i32) -> (i32, i32, i32) {
    %c0_i32 = arith.constant 0 : i32
    %c0_i32_0 = arith.constant 0 : i32
    %c0_i32_1 = arith.constant 0 : i32
    return %arg0, %c0_i32, %c0_i32_0 : i32, i32, i32
  }
  func.func @transform_1(%arg0: i32) -> (i32, i32, i32) {
    %c0_i32 = arith.constant 0 : i32
    %c0_i32_0 = arith.constant 0 : i32
    %c0_i32_1 = arith.constant 0 : i32
    return %arg0, %c0_i32, %c0_i32_0 : i32, i32, i32
  }
  func.func @transform_2(%arg0: i32) -> (i32, i32, i32) {
    %c0_i32 = arith.constant 0 : i32
    %c0_i32_0 = arith.constant 0 : i32
    %c0_i32_1 = arith.constant 0 : i32
    return %arg0, %c0_i32, %c0_i32_0 : i32, i32, i32
  }
  func.func @transform_3(%arg0: i32) -> (i32, i32) {
    %c0_i32 = arith.constant 0 : i32
    %c0_i32_0 = arith.constant 0 : i32
    %c0_i32_1 = arith.constant 0 : i32
    return %c0_i32, %c0_i32_0 : i32, i32
  }
  func.func @transform_4(%arg0: i32) -> (i32, i32) {
    %c0_i32 = arith.constant 0 : i32
    %c0_i32_0 = arith.constant 0 : i32
    %c0_i32_1 = arith.constant 0 : i32
    return %c0_i32, %c0_i32_0 : i32, i32
  }
  func.func @transform_5(%arg0: i32) -> (i32, i32) {
    %c0_i32 = arith.constant 0 : i32
    %c0_i32_0 = arith.constant 0 : i32
    %c0_i32_1 = arith.constant 0 : i32
    return %c0_i32, %c0_i32_0 : i32, i32
  }
  func.func @transform_6(%arg0: i32) -> (i32, i32) {
    %c0_i32 = arith.constant 0 : i32
    %c0_i32_0 = arith.constant 0 : i32
    %c0_i32_1 = arith.constant 0 : i32
    return %c0_i32, %c0_i32_0 : i32, i32
  }
  func.func @transform_7(%arg0: i32) -> (i32, i32) {
    %c0_i32 = arith.constant 0 : i32
    %c0_i32_0 = arith.constant 0 : i32
    %c0_i32_1 = arith.constant 0 : i32
    return %c0_i32, %c0_i32_0 : i32, i32
  }
  func.func @transform_8(%arg0: i32) -> (i32, i32) {
    %c0_i32 = arith.constant 0 : i32
    %c0_i32_0 = arith.constant 0 : i32
    %c0_i32_1 = arith.constant 0 : i32
    return %c0_i32, %c0_i32_0 : i32, i32
  }
  func.func @transform_9(%arg0: i32) -> (i32, i32) {
    %c0_i32 = arith.constant 0 : i32
    %c0_i32_0 = arith.constant 0 : i32
    %c0_i32_1 = arith.constant 0 : i32
    return %c0_i32, %c0_i32_0 : i32, i32
  }
  func.func @transform_10(%arg0: i32) -> (i32, i32) {
    %c0_i32 = arith.constant 0 : i32
    %c0_i32_0 = arith.constant 0 : i32
    %c0_i32_1 = arith.constant 0 : i32
    return %c0_i32, %c0_i32_0 : i32, i32
  }
  func.func @transform_11(%arg0: i32) -> (i32, i32) {
    %c0_i32 = arith.constant 0 : i32
    %c0_i32_0 = arith.constant 0 : i32
    %c0_i32_1 = arith.constant 0 : i32
    return %c0_i32, %c0_i32_0 : i32, i32
  }
  func.func @transform_12(%arg0: i32) -> (i32, i32) {
    %c0_i32 = arith.constant 0 : i32
    %c0_i32_0 = arith.constant 0 : i32
    %c0_i32_1 = arith.constant 0 : i32
    return %c0_i32, %c0_i32_0 : i32, i32
  }
  func.func @transform_13(%arg0: i32) -> (i32, i32) {
    %c0_i32 = arith.constant 0 : i32
    %c0_i32_0 = arith.constant 0 : i32
    %c0_i32_1 = arith.constant 0 : i32
    return %c0_i32, %c0_i32_0 : i32, i32
  }
  func.func @transform_14(%arg0: i32) -> (i32, i32) {
    %c0_i32 = arith.constant 0 : i32
    %c0_i32_0 = arith.constant 0 : i32
    %c0_i32_1 = arith.constant 0 : i32
    return %c0_i32, %c0_i32_0 : i32, i32
  }
  func.func @transform_15(%arg0: i32) -> (i32, i32, i32) {
    %c0_i32 = arith.constant 0 : i32
    %c0_i32_0 = arith.constant 0 : i32
    %c0_i32_1 = arith.constant 0 : i32
    return %arg0, %c0_i32, %c0_i32_0 : i32, i32, i32
  }
}

</mosaic_0001>

<bundles_post_ra>
// kernel: tpu_custom_call.1
= control target key start
LH: loop header
LB: loop body
LE: loop exit
PB: predicated region body
PF: predicated region fallthrough
CT: control target
= control target key end

     0   :  { %20 = vsyncpa [#allocation5], 0  ;;  %s3495_s0 = inlined_call_operand.vmem [shape: f32[4,16,64], index: 0, kind: input, shape index: {}]   ;;  %s3496_s1 = inlined_call_operand.vmem [shape: f32[4,2,256], index: 1, kind: input, shape index: {}]   ;;  %s3497_s2 = inlined_call_operand.vmem [shape: f32[4,2,256], index: 2, kind: input, shape index: {}]   ;;  %s3498_s3 = inlined_call_operand.vmem [shape: bf16[64,384], index: 3, kind: input, shape index: {}]   ;;  %s3499_s4 = inlined_call_operand.vmem [shape: bf16[96,5], index: 4, kind: input, shape index: {}]   ;;  %s3500_s5 = inlined_call_operand.vmem [shape: f32[96,1], index: 5, kind: input, shape index: {}]   ;;  %s3501_s6 = inlined_call_operand.vmem [shape: bf16[1,96], index: 6, kind: input, shape index: {}]   ;;  %s3502_s7 = inlined_call_operand.vmem [shape: f32[1,64], index: 7, kind: input, shape index: {}]   ;;  %s3503_s8 = inlined_call_operand.vmem [shape: f32[1,64], index: 8, kind: input, shape index: {}]   ;;  %s3504_s9 = inlined_call_operand.vmem [shape: bf16[64,128], index: 9, kind: input, shape index: {}]   ;;  %s3505_s10 = inlined_call_operand.vmem [shape: f32[1,128], index: 10, kind: input, shape index: {}]   ;;  %s3506_s11 = inlined_call_operand.vmem [shape: bf16[128,64], index: 11, kind: input, shape index: {}]   ;;  %s3507_s12 = inlined_call_operand.vmem [shape: f32[1,64], index: 12, kind: input, shape index: {}]   ;;  %s3508_s13 = inlined_call_operand.vmem [shape: f32[1,64], index: 13, kind: input, shape index: {}]   ;;  %s3509_s14 = inlined_call_operand.vmem [shape: f32[1,64], index: 14, kind: input, shape index: {}]   ;;  %s3510_s15 = inlined_call_operand.hbm [shape: f32[4,16,64], index: 15, kind: output, shape index: {}]  }
   0x1   :  { %22 = vsyncpa [#allocation5 + $0x1], 0  ;;  %s2818_s18 = smov 0   ;;  %s2820_s19 = smov 0  }
   0x2   :  { %s2822_s20 = smov 0   ;;  %s2824_s21 = smov 0  }
   0x3 LB: > { %3517 = sst [smem:[#allocation7_spill]] %s2710_s18  ;;  %s2839_s22 = sadd.s32 4294967295, %s2722_s21   ;;  %s2722_s21 = sphi %s2824_s21, %s3528_s21   ;;  %s2718_s20 = sphi %s2822_s20, %s3530_s20   ;;  %s2714_s19 = sphi %s2820_s19, %s3532_s19   ;;  %s2710_s18 = sphi %s2818_s18, %s3531_s18  }
   0x4   : > { %3518 = sst [smem:[#allocation8_spill]] %s2718_s20  ;;  %s2343_s23 = sadd.s32 4294967294, %s2722_s21  }
   0x5   : > { %3519 = sst [smem:[#allocation9_spill]] %s2722_s21  ;;  %s2843_s24 = sadd.s32 1, %s2722_s21  }
   0x6   : > { %3520 = sst [smem:[#allocation10_spill]] %s2843_s24  ;;  %s365_s25 = sadd.s32 1, %s2718_s20 }
   0x7   : > { %s362_s26 = ssub.s32 %s2722_s21, %s2843_s24  ;;  %p375_p0 = scmp.ne.s32.totalorder %s2718_s20, %s2714_s19 }
   0x8   : > { %p363_p1 = scmp.eq.s32.totalorder %s362_s26, 0  ;;  %p376_p2 = scmp.eq.s32.totalorder %s2839_s22, 1 }
   0x9   : > { %p381_p3 = scmp.ne.s32.totalorder %s2714_s19, %s2710_s18  ;;  %p382_p4 = scmp.eq.s32.totalorder %s2343_s23, 1 }
   0xa   : > { %s2854_s27 = scalar_select %p363_p1, %s2718_s20, %s365_s25  }
   0xb   : > { %p2856_p5 = por %p376_p2, %p375_p0  ;;  %p2860_p6 = por %p382_p4, %p381_p3 }
   0xc   : > { %3521 = sst [smem:[#allocation11_spill]] %s2854_s27  ;;  %p2346_p7 = scmp.ge.s32.totalorder %s2722_s21, 1 }
   0xd   : > { %s3523_s29 = scalar_select %p2860_p6, 1, 0 }
   0xe   : > { %p466_p8 = scmp.lt.s32.totalorder %s2722_s21, 3 }
   0xf   : > { %3524 = sst [smem:[#allocation12_spill]] %s3523_s29 }
  0x10   : > { %p467_p9 = pnand %p2346_p7, %p466_p8 }
  0x11   : > { %v2586_v0 = vld [vmem:[%s3498_s3 + $0x8] ss:$12 sps:$4 sm:$0xff] (!%p467_p9)   ;;  %v2587_v1 = vld [vmem:[%s3498_s3 + $0x20] ss:$12 sps:$4 sm:$0xff] (!%p467_p9)   ;;  %v2588_v2 = vld [vmem:[%s3498_s3 + $0x38] ss:$12 sps:$4 sm:$0xff] (!%p467_p9)   ;;  %v814_v36 = vlaneseq (!%p467_p9) }
  0x12   : > { %470 = sbr.rel (%p467_p9) target bundleno = 3276 (0xccc), region = 80  ;;  %2464 = vmatprep.subr.bf16.mxu1 (!%p467_p9), %v2586_v0  ;;  %s2348_s27 = sshll.u32 (!%p467_p9), %s2839_s22, 1  ;;  %v2724_v3 = vmov (!%p467_p9), 0   ;;  %v2589_v4 = vld [vmem:[%s3498_s3 + $0x50] ss:$12 sps:$4 sm:$0xff] (!%p467_p9)   ;;  %vm636_vm0 = vcmask (!%p467_p9), 523264  }
  0x13   : > { %2465 = vmatpush3.bf16.msra.mxu1 (!%p467_p9), %v2586_v0  ;;  %p528_p10 = scmp.lt.s32.totalorder (!%p467_p9), %s2348_s27, 3  ;;  %675 = vmatprep.mubr.bf16.mxu0 (!%p467_p9), %v2724_v3  ;;  %v2595_v18 = vld [vmem:[%s3498_s3 + $0x4] ss:$12 sps:$4 sm:$0xff] (!%p467_p9)   ;;  %v2597_v19 = vld [vmem:[%s3498_s3] ss:$12 sps:$4 sm:$0xff] (!%p467_p9)   ;;  %v772_v32 = vld [vmem:[%s3500_s5 + $0x18] sm:$0xff] (!%p467_p9) }
  0x14   : > { %2466 = vmatprep.subr.bf16.mxu1 (!%p467_p9), %v2587_v1  ;;  %2584 = vset.pattern.permute.xlu0 (!%p467_p9), %v2724_v3  ;;  %v2599_v21 = vld [vmem:[%s3498_s3 + $0x1c] ss:$12 sps:$4 sm:$0xff] (!%p467_p9)   ;;  %v2601_v22 = vld [vmem:[%s3498_s3 + $0x18] ss:$12 sps:$4 sm:$0xff] (!%p467_p9)   ;;  %v2602_v24 = vld [vmem:[%s3498_s3 + $0x34] ss:$12 sps:$4 sm:$0xff] (!%p467_p9)  }
  0x15   : > { %2585 = vset.pattern.permute.xlu1 (!%p467_p9), %v2724_v3  ;;  %643 = vmatprep.subr.bf16.mxu0 (!%p467_p9), %v2595_v18  ;;  %v769_v25 = vld [vmem:[%s3500_s5] sm:$0xff] (!%p467_p9)  ;;  %v771_v27 = vld [vmem:[%s3500_s5 + $0x10] sm:$0xff] (!%p467_p9)  ;;  %v770_v30 = vld [vmem:[%s3500_s5 + $0x8] sm:$0xff] (!%p467_p9)  ;;  %v2964_v39 = vshrl.u32 (!%p467_p9), %v814_v36, 7  ;;  %vm867_vm4 = vcmask (!%p467_p9), 1040384   ;;  %vm870_vm5 = vcmask (!%p467_p9), 1041408  }
  0x16   : > { %644 = vmatpush1.bf16.msra.mxu0 (!%p467_p9), %v2597_v19  ;;  %883 = vperm.xlu0 (!%p467_p9), %2584, %v769_v25   ;;  %v2604_v29 = vld [vmem:[%s3498_s3 + $0x30] ss:$12 sps:$4 sm:$0xff] (!%p467_p9)   ;;  %v2605_v31 = vld [vmem:[%s3498_s3 + $0x4c] ss:$12 sps:$4 sm:$0xff] (!%p467_p9)   ;;  %v2607_v33 = vld [vmem:[%s3498_s3 + $0x48] ss:$12 sps:$4 sm:$0xff] (!%p467_p9)  }
  0x17   : > { %2467 = vmatpush3.bf16.msra.mxu1 (!%p467_p9), %v2587_v1  ;;  %645 = vmatprep.subr.bf16.mxu0 (!%p467_p9), %v2599_v21  ;;  %v773_v34 = vld [vmem:[%s3500_s5 + $0x20] sm:$0xff] (!%p467_p9)  ;;  %v774_v35 = vld [vmem:[%s3500_s5 + $0x28] sm:$0xff] (!%p467_p9)  ;;  %v775_v37 = vld [vmem:[%s3500_s5 + $0x30] sm:$0xff] (!%p467_p9)  ;;  %v2976_v49 = vsub.s32 (!%p467_p9), 0, %v2964_v39  ;;  %v2979_v50 = vsub.s32 (!%p467_p9), 2, %v2964_v39  ;;  %v863_v56 = vsub.s32 (!%p467_p9), 3, %v2964_v39 }
  0x18   : > { %2468 = vmatprep.subr.bf16.mxu1 (!%p467_p9), %v2588_v2  ;;  %893 = vperm.xlu1 (!%p467_p9), %2585, %v771_v27   ;;  %v776_v38 = vld [vmem:[%s3500_s5 + $0x38] sm:$0xff] (!%p467_p9)  ;;  %v777_v44 = vld [vmem:[%s3500_s5 + $0x40] sm:$0xff] (!%p467_p9)  ;;  %v778_v47 = vld [vmem:[%s3500_s5 + $0x48] sm:$0xff] (!%p467_p9)  ;;  %v859_v57 = vsub.s32 (!%p467_p9), 1, %v2964_v39  ;;  %vm873_vm6 = vcmask (!%p467_p9), 1042432   ;;  %vm876_vm7 = vcmask (!%p467_p9), 1043456  }
  0x19   : > { %s3534_s27 = smov (!%p528_p10, %s2348_s27), 3  ;;  %v779_v54 = vld [vmem:[%s3500_s5 + $0x50] sm:$0xff]  ;;  %v780_v58 = vld [vmem:[%s3500_s5 + $0x58] sm:$0xff]  ;;  %vm971_vm8 = vcmask 39936   ;;  %v3062_v27 = vld [vmem:[%s3499_s4 + $0x20] sm:$0xff]   ;;  %vm1127_vm9 = vcmask 785408  }
  0x1a   : > { %s2429_s17 = sshll.u32 %s3534_s27, 4  ;;  %s2430_s23 = sshll.u32 %s3534_s27, 2  ;;  %646 = vmatpush1.bf16.msra.mxu0 %v2601_v22  ;;  %888 = vperm.xlu0 %2584, %v770_v30   ;;  %v3046_v25 = vld [vmem:[%s3499_s4 + $0x10] sm:$0xff]   ;;  %vm2727_vm10 = vmmov 0   ;;  %vm1234_vm11 = vcmask 1044480   ;;  %vm1236_vm12 = vcmask 1045504  }
  0x1b   : > { %s2885_s20 = scalar_lea.vmem %s3495_s0, %s2429_s17  ;;  %s539_s30 = scalar_lea.vmem %s3496_s1, %s2430_s23  ;;  %2469 = vmatpush3.bf16.msra.mxu1 %v2588_v2  ;;  %647 = vmatprep.subr.bf16.mxu0 %v2602_v24  ;;  %v3038_v24 = vld [vmem:[%s3499_s4 + $0x8] sm:$0xff]   ;;  %vm1238_vm13 = vcmask 1046528   ;;  %vm1305_vm14 = vcmask 130048  }
  0x1c   : > { %s546_s21 = scalar_lea.vmem %s3497_s2, %s2430_s23  ;;  %v550_v5 = vld [vmem:[%s2885_s20] sm:$0xff]  ;;  %v551_v6 = vld [vmem:[%s2885_s20 + $0x8] sm:$0xff]  ;;  %2470 = vmatprep.subr.bf16.mxu1 %v2589_v4  ;;  %v552_v14 = vld [vmem:[%s2885_s20 + $0x10] sm:$0xff]  ;;  %898 = vperm.xlu1 %2585, %v772_v32   ;;  %s2728_s16 = smov 112  }
  0x1d   : > { %v782_v7 = vld [vmem:[%s539_s30] sm:$0xf]  ;;  %v570_v8 = vpack.c.bf16 %v551_v6, %v550_v5  ;;  %v2390_v10 = vld [vmem:[%s539_s30 + $0x4] sm:$0xf]  ;;  %v553_v15 = vld [vmem:[%s2885_s20 + $0x18] sm:$0xff]  ;;  %s2729_s18 = smov 96  }
  0x1e   : > { %v783_v9 = vld [vmem:[%s546_s21] sm:$0xf]  ;;  %v2391_v11 = vld [vmem:[%s546_s21 + $0x4] sm:$0xf]  ;;  %v2902_v16 = vpack.c.bf16 %v553_v15, %v552_v14  ;;  %648 = vmatpush1.bf16.msra.mxu0 %v2604_v29  ;;  %903 = vperm.xlu0 %2584, %v773_v34   ;;  %s2730_s24 = smov 80   ;;  %s2731_s27 = smov 64  }
  0x1f   : > { %v2895_v12 = vsub.f32 %v782_v7, %v783_v9  ;;  %v2897_v13 = vsub.f32 %v2390_v10, %v2391_v11  ;;  %2472 = vmatprep.mubr.msk.bf16.mxu1 %vm636_vm0, %v570_v8  ;;  %2471 = vmatpush3.bf16.msra.mxu1 %v2589_v4  ;;  %s2732_s21 = smov 48   ;;  %s2733_s29 = smov 32  }
  0x20   : > { %649 = vmatprep.subr.bf16.mxu0 %v2605_v31  ;;  %908 = vperm.xlu1 %2585, %v774_v35   ;;  %s2734_s17 = smov 16   ;;  %s2433_s26 = sshll.u32 %s2839_s22, 9 }
  0x21   : > { %v785_v17 = vmul.f32 %v2895_v12, %v2895_v12  ;;  %v854_v0 = vrot.slane %v2895_v12, %v2979_v50  ;;  %v850_v4 = vrot.slane %v2895_v12, %v2976_v49  ;;  %v864_v5 = vrot.slane %v2895_v12, %v863_v56 }
  0x22   : > { %2473 = vmatmul.mubr.msk.bf16.vlgmr.msra.gmra.mrb[0].mxu1 %vm636_vm0, %v2902_v16  ;;  %650 = vmatpush1.bf16.msra.mxu0 %v2607_v33  ;;  %v860_v6 = vrot.slane %v2895_v12, %v859_v57 }
  0x23   : > { %v2373_v20 = vrot.slane %v785_v17, 9  ;;  %1030 = vmatprep.mubr.bf16.mxu1 %v2724_v3  ;;  %913 = vperm.xlu0 %2584, %v775_v37  }
  0x24   : > { %918 = vperm.xlu1 %2585, %v776_v38  }
  0x25   : > { %v2920_v23 = vadd.f32 %v2373_v20, %v785_v17  ;;  %2369 = vmatmul.mubr.msk.bf16.vlgmr.msra.gmra.mrb[0].mxu0 %vm636_vm0, %v570_v8  ;;  %v2725_v8 = vmov 65535  }
  0x26   : > { %685 = vmatprep.mubr.bf16.mxu0 %v2724_v3  ;;  %v990_v9 = vsel %vm870_vm5, 4294967295, %v2725_v8 }
  0x27   : > { %v791_v26 = vadd.f32 1e-08, %v2920_v23  ;;  %vm799_vm1 = vcmp.gt.f32.partialorder %v2920_v23, 0.0  ;;  %923 = vperm.xlu0 %2584, %v777_v44  }
  0x28   : > { %v800_v28 = vsel %vm799_vm1, %v2920_v23, 1.0  ;;  %928 = vperm.xlu1 %2585, %v778_v47   ;;  %v3030_v23 = vld [vmem:[%s3499_s4] sm:$0xff]  }
  0x29   : > { %2620 = vrsqrt.f32 %v791_v26  ;;  %vm794_vm2 = vcmp.eq.f32.partialorder %v791_v26, inf  ;;  %v797_v41 = vand.u32 2147483648, %v791_v26  ;;  %vm796_vm3 = vcmp.eq.f32.partialorder %v791_v26, 0.0 }
  0x2a   : > { %2622 = vrsqrt.f32 %v800_v28  ;;  %v3070_v28 = vld [vmem:[%s3499_s4 + $0x28] sm:$0xff]  }
  0x2b   : > { %933 = vperm.xlu0 %2584, %v779_v54  }
  0x2c   : > { %938 = vperm.xlu1 %2585, %v780_v58  }
  0x2d   : > { %2370 = vmatmul.mubr.msk.bf16.gmra.mrb[4].mxu0 %vm636_vm0, %v2902_v16 }
  0x2e   : > { %1163 = vmatprep.mubr.bf16.mxu0 %v2724_v3 }
  0x33   : > { %v2621_v40 = vpop.eup %2620 }
  0x34   : > { %v2623_v42 = vpop.eup %2622  ;;  %v793_v43 = vmul.f32 %v2621_v40, %v791_v26 }
  0x35   : > { %v803_v45 = vrot.slane %v2623_v42, 7  ;;  %v811_v46 = vmul.f32 %v2623_v42, %v2895_v12 }
  0x36   : > { %v795_v48 = vsel %vm794_vm2, %v791_v26, %v793_v43  ;;  %v3054_v26 = vld [vmem:[%s3499_s4 + $0x18] sm:$0xff]  }
  0x37   : > { %v798_v51 = vsel %vm796_vm3, %v797_v41, %v795_v48  ;;  %v805_v52 = vmul.f32 %v803_v45, %v2895_v12  ;;  %v812_v53 = vsel %vm799_vm1, %v811_v46, 1.0  ;;  %v3022_v12 = vsel %vm873_vm6, %v990_v9, 0 }
  0x38   : > { %v817_v59 = vrot.slane %v798_v51, %v2976_v49  ;;  %v821_v60 = vrot.slane %v798_v51, %v2979_v50  ;;  %v839_v62 = vrot.slane %v812_v53, %v2976_v49  ;;  %v843_v63 = vrot.slane %v812_v53, %v2979_v50 }
  0x39   : > { %v2374_v55 = vrot.slane %v805_v52, 9 }
  0x3b   : > { %v810_v61 = vsel %vm799_vm1, %v2374_v55, 0.0 }
  0x3c   : > { %v828_v1 = vrot.slane %v810_v61, %v2976_v49  ;;  %v832_v2 = vrot.slane %v810_v61, %v2979_v50 }
  0x3e   : > { %v869_v7 = vsel %vm867_vm4, %v821_v60, %v832_v2  ;;  %v868_v10 = vsel %vm867_vm4, %v817_v59, %v828_v1 }
  0x3f   : > { %v872_v11 = vsel %vm870_vm5, %v869_v7, %v843_v63  ;;  %v871_v14 = vsel %vm870_vm5, %v868_v10, %v839_v62 }
  0x40   : > { %v875_v15 = vsel %vm873_vm6, %v872_v11, %v854_v0  ;;  %v874_v16 = vsel %vm873_vm6, %v871_v14, %v850_v4 }
  0x41   : > { %v878_v17 = vsel %vm876_vm7, %v875_v15, %v864_v5  ;;  %v877_v18 = vsel %vm876_vm7, %v874_v16, %v860_v6 }
  0x42   : > { %v880_v19 = vpack.c.bf16 %v878_v17, %v878_v17  ;;  %v879_v20 = vpack.c.bf16 %v877_v18, %v877_v18 }
  0x44   : > { %v996_v21 = vand.u32 %v3022_v12, %v880_v19  ;;  %v993_v22 = vand.u32 %v3022_v12, %v879_v20 }
  0x46   : > { %998 = vmatprep.subr.bf16.mxu1 %v996_v21 }
  0x47   : > { %999 = vmatpush1.bf16.msra.mxu1 %v993_v22 }
  0x4a   : > { %2381 = vmatmul.mubr.msk.bf16.vlgmr.msra.gmra.mrb[4].mxu1 %vm971_vm8, %v3030_v23 }
  0x4b   : > { %1040 = vmatprep.mubr.bf16.mxu1 %v2724_v3 }
  0x52   : > { %2382 = vmatmul.mubr.msk.bf16.gmra.mrb[8].mxu1 %vm971_vm8, %v3038_v24 }
  0x53   : > { %1050 = vmatprep.mubr.bf16.mxu1 %v2724_v3 }
  0x5a   : > { %2383 = vmatmul.mubr.msk.bf16.gmra.mrb[12].mxu1 %vm971_vm8, %v3046_v25 }
  0x5b   : > { %1060 = vmatprep.mubr.bf16.mxu1 %v2724_v3 }
  0x62   : > { %2384 = vmatmul.mubr.msk.bf16.gmra.mrb[16].mxu1 %vm971_vm8, %v3054_v26 }
  0x63   : > { %1070 = vmatprep.mubr.bf16.mxu1 %v2724_v3 }
  0x6a   : > { %2385 = vmatmul.mubr.msk.bf16.gmra.mrb[20].mxu1 %vm971_vm8, %v3062_v27 }
  0x6b   : > { %1080 = vmatprep.mubr.bf16.mxu1 %v2724_v3 }
  0x72   : > { %2386 = vmatmul.mubr.msk.bf16.gmra.mrb[24].mxu1 %vm971_vm8, %v3070_v28 }
  0x73   : > { %1640 = vmatprep.mubr.bf16.mxu1 %v2724_v3 }
  0x95   : > { %v3111_v48 = vpop.permute.xlu0 %883 }
  0x97   : > { %v3118_v61 = vpop.permute.xlu1 %893 }
  0x99   : > { %v3113_v52 = vpop.permute.xlu0 %888 }
  0x9b   : > { %v3122_v9 = vpop.permute.xlu1 %898 }
  0x9d   : > { %v3127_v22 = vpop.permute.xlu0 %903 }
  0xf5   : > { %v3075_v29 = vpop.f32.mrb[0].mxu1 }
  0xf6   : > { %v3077_v30 = vpop.f32.mrb[1].mxu1 }
  0xf7   : > { %v3079_v31 = vpop.f32.mrb[2].mxu1 }
  0xf8   : > { %v1802_v32 = vpack.c.bf16 %v3079_v31, %v3075_v29  ;;  %v3083_v33 = vpop.f32.mrb[3].mxu1  ;;  %v3087_v35 = vpop.f32.mrb[0].mxu0 }
  0xf9   : > { %v1329_v34 = vpack.c.bf16 %v3083_v33, %v3077_v30  ;;  %v3089_v36 = vpop.f32.mrb[1].mxu0 }
  0xfa   : > { %v3091_v37 = vpop.f32.mrb[2].mxu0 }
  0xfb   : > { %v1256_v38 = vpack.c.bf16 %v3091_v37, %v3087_v35  ;;  %v3095_v40 = vpop.f32.mrb[3].mxu0 }
  0xfc   : > { %v1257_v41 = vpack.c.bf16 %v3095_v40, %v3089_v36 }
 0x100   : > { %v3099_v42 = vpop.f32.mrb[4].mxu0 }
 0x101   : > { %v3101_v43 = vpop.f32.mrb[5].mxu0 }
 0x102   : > { %v3103_v44 = vpop.f32.mrb[6].mxu0 }
 0x103   : > { %v1730_v45 = vpack.c.bf16 %v3103_v44, %v3099_v42  ;;  %v3107_v46 = vpop.f32.mrb[7].mxu0 }
 0x104   : > { %v1731_v47 = vpack.c.bf16 %v3107_v46, %v3101_v43 }
 0x11d   : > { %v1032_v51 = vpop.f32.mrb[4].mxu1 }
 0x11e   : > { %v1033_v53 = vadd.f32 %v1032_v51, %v3111_v48  ;;  %v1034_v54 = vpop.f32.mrb[5].mxu1 }
 0x11f   : > { %v1035_v55 = vadd.f32 %v1034_v54, %v3111_v48  ;;  %v1036_v58 = vpop.f32.mrb[6].mxu1 }
 0x120   : > { %v1037_v59 = vadd.f32 %v1036_v58, %v3113_v52  ;;  %v1038_v60 = vpop.f32.mrb[7].mxu1  ;;  %v1091_v63 = vmax.f32 %v1033_v53, 0.0  ;;  %v3130_v58 = vpop.permute.xlu1 %908 }
 0x121   : > { %v1039_v62 = vadd.f32 %v1038_v60, %v3113_v52  ;;  %v1092_v1 = vmax.f32 %v1035_v55, 0.0 }
 0x122   : > { %v1093_v0 = vmax.f32 %v1037_v59, 0.0 }
 0x123   : > { %v1094_v2 = vmax.f32 %v1039_v62, 0.0 }
 0x124   : > { %v1115_v4 = vpack.c.bf16 %v1093_v0, %v1091_v63 }
 0x125   : > { %v1116_v5 = vpack.c.bf16 %v1094_v2, %v1092_v1  ;;  %v1042_v6 = vpop.f32.mrb[8].mxu1 }
 0x126   : > { %v1043_v7 = vadd.f32 %v1042_v6, %v3118_v61  ;;  %v1044_v8 = vpop.f32.mrb[9].mxu1 }
 0x127   : > { %v1045_v10 = vadd.f32 %v1044_v8, %v3118_v61  ;;  %v1046_v11 = vpop.f32.mrb[10].mxu1  ;;  %1131 = vmatprep.subr.bf16.mxu0 %v1116_v5 }
 0x128   : > { %v1047_v14 = vadd.f32 %v1046_v11, %v3122_v9  ;;  %v1048_v15 = vpop.f32.mrb[11].mxu1  ;;  %1132 = vmatpush1.bf16.msra.mxu0 %v1115_v4  ;;  %v1095_v17 = vmax.f32 %v1043_v7, 0.0  ;;  %v3135_v7 = vpop.permute.xlu0 %913 }
 0x129   : > { %v1049_v16 = vadd.f32 %v1048_v15, %v3122_v9  ;;  %v1096_v19 = vmax.f32 %v1045_v10, 0.0  ;;  %v3138_v15 = vpop.permute.xlu1 %918 }
 0x12a   : > { %v1097_v18 = vmax.f32 %v1047_v14, 0.0 }
 0x12b   : > { %v1098_v20 = vmax.f32 %v1049_v16, 0.0 }
 0x12c   : > { %v1117_v21 = vpack.c.bf16 %v1097_v18, %v1095_v17 }
 0x12d   : > { %v1118_v51 = vpack.c.bf16 %v1098_v20, %v1096_v19  ;;  %v1052_v53 = vpop.f32.mrb[12].mxu1 }
 0x12e   : > { %v1053_v54 = vadd.f32 %v1052_v53, %v3127_v22  ;;  %v1054_v55 = vpop.f32.mrb[13].mxu1 }
 0x12f   : > { %v1055_v59 = vadd.f32 %v1054_v55, %v3127_v22  ;;  %v1056_v60 = vpop.f32.mrb[14].mxu1  ;;  %1133 = vmatprep.subr.bf16.mxu0 %v1118_v51 }
 0x130   : > { %v1057_v62 = vadd.f32 %v1056_v60, %v3130_v58  ;;  %v1058_v63 = vpop.f32.mrb[15].mxu1  ;;  %1134 = vmatpush1.bf16.msra.mxu0 %v1117_v21  ;;  %v1099_v1 = vmax.f32 %v1053_v54, 0.0 }
 0x131   : > { %v1059_v0 = vadd.f32 %v1058_v63, %v3130_v58  ;;  %v1100_v4 = vmax.f32 %v1055_v59, 0.0  ;;  %v3143_v59 = vpop.permute.xlu0 %923 }
 0x132   : > { %v1101_v2 = vmax.f32 %v1057_v62, 0.0 }
 0x133   : > { %v1102_v5 = vmax.f32 %v1059_v0, 0.0 }
 0x134   : > { %v1119_v6 = vpack.c.bf16 %v1101_v2, %v1099_v1  ;;  %v3146_v1 = vpop.permute.xlu1 %928 }
 0x135   : > { %v1120_v8 = vpack.c.bf16 %v1102_v5, %v1100_v4  ;;  %v1062_v10 = vpop.f32.mrb[16].mxu1 }
 0x136   : > { %v1063_v11 = vadd.f32 %v1062_v10, %v3135_v7  ;;  %v1064_v14 = vpop.f32.mrb[17].mxu1 }
 0x137   : > { %v1065_v16 = vadd.f32 %v1064_v14, %v3135_v7  ;;  %v1066_v17 = vpop.f32.mrb[18].mxu1  ;;  %1135 = vmatprep.subr.bf16.mxu0 %v1120_v8 }
 0x138   : > { %v1067_v18 = vadd.f32 %v1066_v17, %v3138_v15  ;;  %v1068_v19 = vpop.f32.mrb[19].mxu1  ;;  %1136 = vmatpush1.bf16.msra.mxu0 %v1119_v6  ;;  %v1103_v21 = vmax.f32 %v1063_v11, 0.0 }
 0x139   : > { %v1069_v20 = vadd.f32 %v1068_v19, %v3138_v15  ;;  %v1104_v53 = vmax.f32 %v1065_v16, 0.0 }
 0x13a   : > { %v1105_v51 = vmax.f32 %v1067_v18, 0.0  ;;  %v3151_v18 = vpop.permute.xlu0 %933 }
 0x13b   : > { %v1106_v54 = vmax.f32 %v1069_v20, 0.0 }
 0x13c   : > { %v1121_v55 = vpack.c.bf16 %v1105_v51, %v1103_v21 }
 0x13d   : > { %v1122_v60 = vpack.c.bf16 %v1106_v54, %v1104_v53  ;;  %v1072_v62 = vpop.f32.mrb[20].mxu1  ;;  %v3154_v53 = vpop.permute.xlu1 %938 }
 0x13e   : > { %v1073_v63 = vadd.f32 %v1072_v62, %v3143_v59  ;;  %v1074_v0 = vpop.f32.mrb[21].mxu1 }
 0x13f   : > { %v1075_v2 = vadd.f32 %v1074_v0, %v3143_v59  ;;  %v1076_v4 = vpop.f32.mrb[22].mxu1  ;;  %1137 = vmatprep.subr.bf16.mxu0 %v1122_v60 }
 0x140   : > { %v1077_v5 = vadd.f32 %v1076_v4, %v3146_v1  ;;  %v1078_v6 = vpop.f32.mrb[23].mxu1  ;;  %1138 = vmatpush1.bf16.msra.mxu0 %v1121_v55  ;;  %v1107_v10 = vmax.f32 %v1073_v63, 0.0 }
 0x141   : > { %v1079_v8 = vadd.f32 %v1078_v6, %v3146_v1  ;;  %v1108_v14 = vmax.f32 %v1075_v2, 0.0 }
 0x142   : > { %v1109_v11 = vmax.f32 %v1077_v5, 0.0 }
 0x143   : > { %v1110_v16 = vmax.f32 %v1079_v8, 0.0 }
 0x144   : > { %v1123_v17 = vpack.c.bf16 %v1109_v11, %v1107_v10  ;;  %v3162_v10 = vld [vmem:[%s3501_s6] sm:$0x1]  ;;  %v2726_v11 = vmov 0.0  }
 0x145   : > { %v1124_v19 = vpack.c.bf16 %v1110_v16, %v1108_v14  ;;  %v1082_v20 = vpop.f32.mrb[24].mxu1  ;;  %v1262_v14 = vsel %vm636_vm0, %v1257_v41, 0 }
 0x146   : > { %v1083_v21 = vadd.f32 %v1082_v20, %v3151_v18  ;;  %v1084_v51 = vpop.f32.mrb[25].mxu1 }
 0x147   : > { %v1085_v54 = vadd.f32 %v1084_v51, %v3151_v18  ;;  %v1086_v60 = vpop.f32.mrb[26].mxu1  ;;  %1139 = vmatprep.subr.bf16.mxu0 %v1124_v19 }
 0x148   : > { %v1087_v55 = vadd.f32 %v1086_v60, %v3154_v53  ;;  %v1088_v62 = vpop.f32.mrb[27].mxu1  ;;  %1140 = vmatpush1.bf16.msra.mxu0 %v1123_v17  ;;  %v1111_v0 = vmax.f32 %v1083_v21, 0.0 }
 0x149   : > { %v1089_v63 = vadd.f32 %v1088_v62, %v3154_v53  ;;  %v1112_v4 = vmax.f32 %v1085_v54, 0.0 }
 0x14a   : > { %v1113_v2 = vmax.f32 %v1087_v55, 0.0 }
 0x14b   : > { %v1114_v5 = vmax.f32 %v1089_v63, 0.0 }
 0x14c   : > { %v1125_v6 = vpack.c.bf16 %v1113_v2, %v1111_v0 }
 0x14d   : > { %v1126_v8 = vpack.c.bf16 %v1114_v5, %v1112_v4 }
 0x14f   : > { %1141 = vmatprep.subr.bf16.mxu0 %v1126_v8 }
 0x150   : > { %1142 = vmatpush1.bf16.msra.mxu0 %v1125_v6 }
 0x151   : > { %2476 = vmatprep.subr.bf16.mxu0 %v2726_v11 }
 0x153   : > { %2387 = vmatmul.mubr.msk.bf16.vlgmr.msra.gmra.mrb[8].mxu0 %vm1127_vm9, %v3162_v10 }
 0x154   : > { %2478 = vmatprep.mubr.msk.bf16.mxu0 %vm2727_vm10, %v2726_v11 }
 0x159   : > { %2477 = vmatpush3.bf16.xpose.msra.mxu0 %v1262_v14 }
 0x15a   : > { %2482 = vmatprep.subr.bf16.mxu0 %v2726_v11 }
 0x160   : > { %2479 = vmatmul.mubr.msk.bf16.vlgmr.msra.gmra.mrb[12].mxu0 %vm636_vm0, %v1256_v38 }
 0x161   : > { %2483 = vmatpush3.bf16.msra.mxu0 %v1329_v34  ;;  %2484 = vmatprep.mubr.msk.bf16.mxu0 %vm2727_vm10, %v2726_v11 }
 0x226   : > { %v1165_v16 = vpop.f32.mrb[8].mxu0 }
 0x227   : > { %v1167_v17 = vpop.f32.mrb[9].mxu0  ;;  %v1173_v36 = vrot.slane %v1165_v16, 7  ;;  %v1177_v35 = vrot.slane %v1165_v16, 6  ;;  %v1181_v30 = vrot.slane %v1165_v16, 5  ;;  %v1185_v34 = vrot.slane %v1165_v16, 4 }
 0x228   : > { %v1169_v40 = vpop.f32.mrb[10].mxu0  ;;  %v1202_v41 = vrot.slane %v1167_v17, 7  ;;  %v1206_v37 = vrot.slane %v1167_v17, 6  ;;  %v1210_v33 = vrot.slane %v1167_v17, 5  ;;  %v1214_v20 = vrot.slane %v1167_v17, 4 }
 0x229   : > { %1174 = vrot.lane.b32.xlu0 %v1173_v36, %s2728_s16  ;;  %v1170_v19 = vpop.f32.mrb[11].mxu0  ;;  %v1189_v60 = vrot.slane %v1165_v16, 3  ;;  %v1218_v55 = vrot.slane %v1167_v17, 3  ;;  %v1193_v62 = vrot.slane %v1165_v16, 2  ;;  %v1222_v63 = vrot.slane %v1167_v17, 2 }
 0x22a   : > { %1203 = vrot.lane.b32.xlu1 %v1202_v41, %s2728_s16  ;;  %v1197_v0 = vrot.slane %v1165_v16, 1  ;;  %v1226_v2 = vrot.slane %v1167_v17, 1 }
 0x22d   : > { %1178 = vrot.lane.b32.xlu0 %v1177_v35, %s2729_s18 }
 0x22e   : > { %1207 = vrot.lane.b32.xlu1 %v1206_v37, %s2729_s18 }
 0x231   : > { %1182 = vrot.lane.b32.xlu0 %v1181_v30, %s2730_s24 }
 0x232   : > { %1211 = vrot.lane.b32.xlu1 %v1210_v33, %s2730_s24 }
 0x233   : > { %v1298_v38 = vpop.f32.mrb[12].mxu0 }
 0x234   : > { %v2480_v21 = vpop.f32.mrb[13].mxu0 }
 0x235   : > { %1186 = vrot.lane.b32.xlu0 %v1185_v34, %s2731_s27  ;;  %v1301_v51 = vpop.f32.mrb[14].mxu0 }
 0x236   : > { %1215 = vrot.lane.b32.xlu1 %v1214_v20, %s2731_s27  ;;  %v2481_v54 = vpop.f32.mrb[15].mxu0 }
 0x239   : > { %1190 = vrot.lane.b32.xlu0 %v1189_v60, %s2732_s21 }
 0x23a   : > { %1219 = vrot.lane.b32.xlu1 %v1218_v55, %s2732_s21 }
 0x23d   : > { %1194 = vrot.lane.b32.xlu0 %v1193_v62, %s2733_s29 }
 0x23e   : > { %1223 = vrot.lane.b32.xlu1 %v1222_v63, %s2733_s29 }
 0x241   : > { %1198 = vrot.lane.b32.xlu0 %v1197_v0, %s2734_s17 }
 0x242   : > { %1227 = vrot.lane.b32.xlu1 %v1226_v2, %s2734_s17 }
 0x29b   : > { %v1175_v4 = vpop.permute.xlu0 %1174 }
 0x29c   : > { %v1204_v5 = vpop.permute.xlu1 %1203  ;;  %v1230_v37 = vsel %vm867_vm4, %v1165_v16, %v1175_v4 }
 0x29d   : > { %v1240_v30 = vsel %vm867_vm4, %v1167_v17, %v1204_v5 }
 0x29f   : > { %v1179_v6 = vpop.permute.xlu0 %1178 }
 0x2a0   : > { %v1208_v8 = vpop.permute.xlu1 %1207  ;;  %v1231_v33 = vsel %vm870_vm5, %v1230_v37, %v1179_v6 }
 0x2a1   : > { %v1241_v20 = vsel %vm870_vm5, %v1240_v30, %v1208_v8 }
 0x2a3   : > { %v1183_v14 = vpop.permute.xlu0 %1182 }
 0x2a4   : > { %v1212_v36 = vpop.permute.xlu1 %1211  ;;  %v1232_v21 = vsel %vm873_vm6, %v1231_v33, %v1183_v14 }
 0x2a5   : > { %v1242_v60 = vsel %vm873_vm6, %v1241_v20, %v1212_v36 }
 0x2a7   : > { %v1187_v40 = vpop.permute.xlu0 %1186 }
 0x2a8   : > { %v1216_v41 = vpop.permute.xlu1 %1215  ;;  %v1233_v55 = vsel %vm876_vm7, %v1232_v21, %v1187_v40 }
 0x2a9   : > { %v1243_v62 = vsel %vm876_vm7, %v1242_v60, %v1216_v41 }
 0x2ab   : > { %v1191_v19 = vpop.permute.xlu0 %1190 }
 0x2ac   : > { %v1220_v35 = vpop.permute.xlu1 %1219  ;;  %v1235_v16 = vsel %vm1234_vm11, %v1233_v55, %v1191_v19 }
 0x2ad   : > { %v1244_v17 = vsel %vm1234_vm11, %v1243_v62, %v1220_v35 }
 0x2af   : > { %v1195_v34 = vpop.permute.xlu0 %1194 }
 0x2b0   : > { %v1224_v54 = vpop.permute.xlu1 %1223  ;;  %v1237_v63 = vsel %vm1236_vm12, %v1235_v16, %v1195_v34 }
 0x2b1   : > { %v1245_v2 = vsel %vm1236_vm12, %v1244_v17, %v1224_v54 }
 0x2b3   : > { %v1199_v0 = vpop.permute.xlu0 %1198 }
 0x2b4   : > { %v1239_v4 = vsel %vm1238_vm13, %v1237_v63, %v1199_v0  ;;  %v1228_v5 = vpop.permute.xlu1 %1227 }
 0x2b5   : > { %v1246_v6 = vsel %vm1238_vm13, %v1245_v2, %v1228_v5  ;;  %v1299_v8 = vadd.f32 %v1298_v38, %v1239_v4 }
 0x2b6   : > { %v1302_v14 = vadd.f32 %v1301_v51, %v1246_v6  ;;  %v1381_v51 = vmul.f32 %v2897_v13, %v2897_v13 }
 0x2b7   : > { %v1306_v36 = vsel %vm1305_vm14, %v1299_v8, -inf }
 0x2b8   : > { %1307 = vmax.xlane.f32.xlu0 %v1306_v36  ;;  %v1309_v40 = vsel %vm1305_vm14, %v1302_v14, -inf  ;;  %v2392_v54 = vrot.slane %v1381_v51, 9 }
 0x2b9   : > { %1310 = vmax.xlane.f32.xlu1 %v1309_v40 }
 0x2ba   : > { %v1386_v60 = vadd.f32 %v2392_v54, %v1381_v51  ;;  %v1460_v51 = vrot.slane %v2897_v13, %v863_v56 }
 0x2bc   : > { %vm1395_vm15 = vcmp.gt.f32.partialorder %v1386_v60, 0.0  ;;  %v1387_v62 = vadd.f32 1e-08, %v1386_v60 }
 0x2bd   : > { %v1396_v55 = vsel %vm1395_vm15, %v1386_v60, 1.0  ;;  %v1446_v60 = vrot.slane %v2897_v13, %v2976_v49 }
 0x2be   : > { %vm1390_vm1 = vcmp.eq.f32.partialorder %v1387_v62, inf  ;;  %v1393_v4 = vand.u32 2147483648, %v1387_v62  ;;  %vm1392_vm2 = vcmp.eq.f32.partialorder %v1387_v62, 0.0 }
 0x345   : > { %v1308_v41 = vpop.xlane.xlu0 %1307 }
 0x346   : > { %v1312_v19 = vsub.f32 %v1299_v8, %v1308_v41  ;;  %v1311_v35 = vpop.xlane.xlu1 %1310 }
 0x347   : > { %v1313_v37 = vsub.f32 %v1302_v14, %v1311_v35 }
 0x348   : > { %v1314_v30 = vmul.f32 1.442695, %v1312_v19 }
 0x349   : > { %v1316_v33 = vmul.f32 1.442695, %v1313_v37 }
 0x34a   : > { %2624 = vpow2.f32 %v1314_v30 }
 0x34b   : > { %2626 = vpow2.f32 %v1316_v33 }
 0x34c   : > { %2628 = vrsqrt.f32 %v1396_v55  ;;  %v1456_v55 = vrot.slane %v2897_v13, %v859_v57 }
 0x34d   : > { %2630 = vrsqrt.f32 %v1387_v62 }
 0x354   : > { %v2625_v34 = vpop.eup %2624 }
 0x355   : > { %v1318_v20 = vsel %vm1305_vm14, %v2625_v34, 0.0  ;;  %v2627_v21 = vpop.eup %2626 }
 0x356   : > { %1319 = vadd.xlane.f32.xlu0 %v1318_v20  ;;  %v1321_v38 = vsel %vm1305_vm14, %v2627_v21, 0.0  ;;  %v2629_v16 = vpop.eup %2628  ;;  %v1450_v20 = vrot.slane %v2897_v13, %v2979_v50 }
 0x357   : > { %v1399_v17 = vrot.slane %v2629_v16, 7  ;;  %v2631_v63 = vpop.eup %2630  ;;  %v1407_v8 = vmul.f32 %v2629_v16, %v2897_v13 }
 0x358   : > { %v1389_v2 = vmul.f32 %v2631_v63, %v1387_v62 }
 0x359   : > { %v1401_v0 = vmul.f32 %v1399_v17, %v2897_v13  ;;  %v1408_v40 = vsel %vm1395_vm15, %v1407_v8, 1.0 }
 0x35a   : > { %1322 = vadd.xlane.f32.xlu0 %v1321_v38  ;;  %v1391_v6 = vsel %vm1390_vm1, %v1387_v62, %v1389_v2  ;;  %v1439_v30 = vrot.slane %v1408_v40, %v2979_v50  ;;  %v1435_v33 = vrot.slane %v1408_v40, %v2976_v49 }
 0x35b   : > { %v2393_v5 = vrot.slane %v1401_v0, 9  ;;  %v1394_v14 = vsel %vm1392_vm2, %v1393_v4, %v1391_v6 }
 0x35c   : > { %v1417_v41 = vrot.slane %v1394_v14, %v2979_v50  ;;  %v1413_v35 = vrot.slane %v1394_v14, %v2976_v49 }
 0x35d   : > { %v1406_v36 = vsel %vm1395_vm15, %v2393_v5, 0.0 }
 0x35e   : > { %v1428_v19 = vrot.slane %v1406_v36, %v2979_v50  ;;  %v1424_v37 = vrot.slane %v1406_v36, %v2976_v49 }
 0x360   : > { %v1464_v38 = vsel %vm867_vm4, %v1417_v41, %v1428_v19  ;;  %v1463_v16 = vsel %vm867_vm4, %v1413_v35, %v1424_v37 }
 0x361   : > { %v1466_v54 = vsel %vm870_vm5, %v1464_v38, %v1439_v30  ;;  %v1465_v17 = vsel %vm870_vm5, %v1463_v16, %v1435_v33 }
 0x362   : > { %v1468_v62 = vsel %vm873_vm6, %v1466_v54, %v1450_v20  ;;  %v1467_v56 = vsel %vm873_vm6, %v1465_v17, %v1446_v60 }
 0x363   : > { %v1470_v50 = vsel %vm876_vm7, %v1468_v62, %v1460_v51  ;;  %v1469_v0 = vsel %vm876_vm7, %v1467_v56, %v1456_v55 }
 0x364   : > { %v1472_v63 = vpack.c.bf16 %v1470_v50, %v1470_v50  ;;  %v1471_v57 = vpack.c.bf16 %v1469_v0, %v1469_v0 }
 0x366   : > { %v1477_v2 = vand.u32 %v1472_v63, %v3022_v12  ;;  %v1474_v8 = vand.u32 %v1471_v57, %v3022_v12 }
 0x368   : > { %1479 = vmatprep.subr.bf16.mxu0 %v1477_v2 }
 0x3e3   : > { %v1320_v49 = vpop.xlane.xlu0 %1319 }
 0x3e4   : > { %2632 = vrcp.f32 %v1320_v49 }
 0x3e7   : > { %v1323_v39 = vpop.xlane.xlu0 %1322 }
 0x3e8   : > { %2634 = vrcp.f32 %v1323_v39 }
 0x3ee   : > { %v2633_v13 = vpop.eup %2632 }
 0x3ef   : > { %v1325_v5 = vmul.f32 %v2633_v13, %v2625_v34 }
 0x3f2   : > { %v2635_v4 = vpop.eup %2634 }
 0x3f3   : > { %v1327_v6 = vmul.f32 %v2635_v4, %v2627_v21 }
 0x3f5   : > { %v1328_v14 = vpack.c.bf16 %v1327_v6, %v1325_v5 }
 0x3f7   : > { %2485 = vmatmul.mubr.msk.bf16.vlgmr.msra.gmra.mrb[16].mxu0 %vm1305_vm14, %v1328_v14 }
 0x3f8   : > { %1480 = vmatpush1.bf16.msra.mxu0 %v1474_v8  ;;  %1511 = vmatprep.mubr.bf16.mxu0 %v2724_v3 }
 0x3ff   : > { %2394 = vmatmul.mubr.msk.bf16.vlgmr.msra.gmra.mrb[20].mxu0 %vm971_vm8, %v3030_v23 }
 0x400   : > { %1521 = vmatprep.mubr.bf16.mxu0 %v2724_v3 }
 0x407   : > { %2395 = vmatmul.mubr.msk.bf16.gmra.mrb[24].mxu0 %vm971_vm8, %v3038_v24 }
 0x408   : > { %1531 = vmatprep.mubr.bf16.mxu0 %v2724_v3 }
 0x40f   : > { %2396 = vmatmul.mubr.msk.bf16.gmra.mrb[28].mxu0 %vm971_vm8, %v3046_v25 }
 0x410   : > { %1541 = vmatprep.mubr.bf16.mxu0 %v2724_v3 }
 0x417   : > { %2397 = vmatmul.mubr.msk.bf16.gmra.mrb[32].mxu0 %vm971_vm8, %v3054_v26 }
 0x418   : > { %1551 = vmatprep.mubr.bf16.mxu0 %v2724_v3 }
 0x41f   : > { %2398 = vmatmul.mubr.msk.bf16.gmra.mrb[36].mxu0 %vm971_vm8, %v3062_v27 }
 0x420   : > { %1561 = vmatprep.mubr.bf16.mxu0 %v2724_v3 }
 0x427   : > { %2399 = vmatmul.mubr.msk.bf16.gmra.mrb[40].mxu0 %vm971_vm8, %v3070_v28 }
 0x4ca   : > { %v1367_v12 = vpop.f32.mrb[16].mxu0 }
 0x4cb   : > { %1374 = vst.msk [vmem:[#allocation3] sm:$0xff] %vm636_vm0, %v1367_v12  ;;  %v2486_v23 = vpop.f32.mrb[17].mxu0 }
 0x4cc   : > { %v1370_v24 = vpop.f32.mrb[18].mxu0 }
 0x4cd   : > { %1375 = vst.msk [vmem:[#allocation3 + $0x8] sm:$0xff] %vm636_vm0, %v1370_v24  ;;  %v2487_v25 = vpop.f32.mrb[19].mxu0 }
 0x4d2   : > { %v1513_v34 = vpop.f32.mrb[20].mxu0 }
 0x4d3   : > { %v1514_v26 = vadd.f32 %v1513_v34, %v3111_v48  ;;  %v1515_v21 = vpop.f32.mrb[21].mxu0 }
 0x4d4   : > { %v1516_v36 = vadd.f32 %v1515_v21, %v3111_v48  ;;  %v1517_v27 = vpop.f32.mrb[22].mxu0 }
 0x4d5   : > { %v1518_v3 = vadd.f32 %v1517_v27, %v3113_v52  ;;  %v1519_v40 = vpop.f32.mrb[23].mxu0  ;;  %v1572_v41 = vmax.f32 %v1514_v26, 0.0 }
 0x4d6   : > { %v1520_v28 = vadd.f32 %v1519_v40, %v3113_v52  ;;  %v1573_v35 = vmax.f32 %v1516_v36, 0.0 }
 0x4d7   : > { %v1574_v19 = vmax.f32 %v1518_v3, 0.0 }
 0x4d8   : > { %v1575_v37 = vmax.f32 %v1520_v28, 0.0 }
 0x4d9   : > { %v1596_v30 = vpack.c.bf16 %v1574_v19, %v1572_v41 }
 0x4da   : > { %v1597_v33 = vpack.c.bf16 %v1575_v37, %v1573_v35  ;;  %v1523_v20 = vpop.f32.mrb[24].mxu0 }
 0x4db   : > { %v1524_v38 = vadd.f32 %v1523_v20, %v3118_v61  ;;  %v1525_v51 = vpop.f32.mrb[25].mxu0 }
 0x4dc   : > { %v1526_v54 = vadd.f32 %v1525_v51, %v3118_v61  ;;  %v1527_v60 = vpop.f32.mrb[26].mxu0  ;;  %1608 = vmatprep.subr.bf16.mxu1 %v1597_v33 }
 0x4dd   : > { %v1528_v48 = vadd.f32 %v1527_v60, %v3122_v9  ;;  %v1529_v55 = vpop.f32.mrb[27].mxu0  ;;  %1609 = vmatpush1.bf16.msra.mxu1 %v1596_v30  ;;  %v1576_v62 = vmax.f32 %v1524_v38, 0.0 }
 0x4de   : > { %v1530_v52 = vadd.f32 %v1529_v55, %v3122_v9  ;;  %v1577_v50 = vmax.f32 %v1526_v54, 0.0 }
 0x4df   : > { %v1578_v16 = vmax.f32 %v1528_v48, 0.0 }
 0x4e0   : > { %v1579_v17 = vmax.f32 %v1530_v52, 0.0 }
 0x4e1   : > { %v1598_v63 = vpack.c.bf16 %v1578_v16, %v1576_v62 }
 0x4e2   : > { %v1599_v56 = vpack.c.bf16 %v1579_v17, %v1577_v50  ;;  %v1533_v0 = vpop.f32.mrb[28].mxu0 }
 0x4e3   : > { %v1534_v2 = vadd.f32 %v1533_v0, %v3127_v22  ;;  %v1535_v49 = vpop.f32.mrb[29].mxu0 }
 0x4e4   : > { %v1536_v61 = vadd.f32 %v1535_v49, %v3127_v22  ;;  %v1537_v39 = vpop.f32.mrb[30].mxu0  ;;  %1610 = vmatprep.subr.bf16.mxu1 %v1599_v56 }
 0x4e5   : > { %v1538_v13 = vadd.f32 %v1537_v39, %v3130_v58  ;;  %v1539_v57 = vpop.f32.mrb[31].mxu0  ;;  %1611 = vmatpush1.bf16.msra.mxu1 %v1598_v63  ;;  %v1580_v4 = vmax.f32 %v1534_v2, 0.0 }
 0x4e6   : > { %v1540_v9 = vadd.f32 %v1539_v57, %v3130_v58  ;;  %v1581_v6 = vmax.f32 %v1536_v61, 0.0 }
 0x4e7   : > { %v1582_v5 = vmax.f32 %v1538_v13, 0.0 }
 0x4e8   : > { %v1583_v8 = vmax.f32 %v1540_v9, 0.0 }
 0x4e9   : > { %v1600_v14 = vpack.c.bf16 %v1582_v5, %v1580_v4 }
 0x4ea   : > { %v1601_v12 = vpack.c.bf16 %v1583_v8, %v1581_v6  ;;  %v1543_v23 = vpop.f32.mrb[32].mxu0 }
 0x4eb   : > { %v1544_v24 = vadd.f32 %v1543_v23, %v3135_v7  ;;  %v1545_v25 = vpop.f32.mrb[33].mxu0 }
 0x4ec   : > { %v1546_v22 = vadd.f32 %v1545_v25, %v3135_v7  ;;  %v1547_v34 = vpop.f32.mrb[34].mxu0  ;;  %1612 = vmatprep.subr.bf16.mxu1 %v1601_v12 }
 0x4ed   : > { %v1548_v26 = vadd.f32 %v1547_v34, %v3138_v15  ;;  %v1549_v21 = vpop.f32.mrb[35].mxu0  ;;  %1613 = vmatpush1.bf16.msra.mxu1 %v1600_v14  ;;  %v1584_v36 = vmax.f32 %v1544_v24, 0.0 }
 0x4ee   : > { %v1550_v58 = vadd.f32 %v1549_v21, %v3138_v15  ;;  %v1585_v3 = vmax.f32 %v1546_v22, 0.0 }
 0x4ef   : > { %v1586_v27 = vmax.f32 %v1548_v26, 0.0 }
 0x4f0   : > { %v1587_v40 = vmax.f32 %v1550_v58, 0.0 }
 0x4f1   : > { %v1602_v28 = vpack.c.bf16 %v1586_v27, %v1584_v36 }
 0x4f2   : > { %v1603_v41 = vpack.c.bf16 %v1587_v40, %v1585_v3  ;;  %v1553_v19 = vpop.f32.mrb[36].mxu0 }
 0x4f3   : > { %v1554_v35 = vadd.f32 %v1553_v19, %v3143_v59  ;;  %v1555_v37 = vpop.f32.mrb[37].mxu0 }
 0x4f4   : > { %v1556_v7 = vadd.f32 %v1555_v37, %v3143_v59  ;;  %v1557_v30 = vpop.f32.mrb[38].mxu0  ;;  %1614 = vmatprep.subr.bf16.mxu1 %v1603_v41 }
 0x4f5   : > { %v1558_v33 = vadd.f32 %v1557_v30, %v3146_v1  ;;  %v1559_v20 = vpop.f32.mrb[39].mxu0  ;;  %1615 = vmatpush1.bf16.msra.mxu1 %v1602_v28  ;;  %v1588_v38 = vmax.f32 %v1554_v35, 0.0 }
 0x4f6   : > { %v1560_v15 = vadd.f32 %v1559_v20, %v3146_v1  ;;  %v1589_v54 = vmax.f32 %v1556_v7, 0.0 }
 0x4f7   : > { %v1590_v51 = vmax.f32 %v1558_v33, 0.0 }
 0x4f8   : > { %v1591_v60 = vmax.f32 %v1560_v15, 0.0 }
 0x4f9   : > { %v1604_v48 = vpack.c.bf16 %v1590_v51, %v1588_v38 }
 0x4fa   : > { %v1605_v55 = vpack.c.bf16 %v1591_v60, %v1589_v54  ;;  %v1563_v52 = vpop.f32.mrb[40].mxu0 }
 0x4fb   : > { %v1564_v62 = vadd.f32 %v1563_v52, %v3151_v18  ;;  %v1565_v16 = vpop.f32.mrb[41].mxu0 }
 0x4fc   : > { %v1566_v59 = vadd.f32 %v1565_v16, %v3151_v18  ;;  %v1567_v50 = vpop.f32.mrb[42].mxu0  ;;  %1616 = vmatprep.subr.bf16.mxu1 %v1605_v55  ;;  %v1736_v18 = vsel %vm636_vm0, %v1731_v47, 0 }
 0x4fd   : > { %v1568_v17 = vadd.f32 %v1567_v50, %v3154_v53  ;;  %v1569_v63 = vpop.f32.mrb[43].mxu0  ;;  %1617 = vmatpush1.bf16.msra.mxu1 %v1604_v48  ;;  %v1592_v56 = vmax.f32 %v1564_v62, 0.0  ;;  %v1854_v50 = vld [vmem:[#allocation3] sm:$0xff] }
 0x4fe   : > { %v1570_v1 = vadd.f32 %v1569_v63, %v3154_v53  ;;  %v1593_v2 = vmax.f32 %v1566_v59, 0.0  ;;  %v1850_v59 = vld [vmem:[%s2885_s20] sm:$0xff] }
 0x4ff   : > { %v1594_v0 = vmax.f32 %v1568_v17, 0.0 }
 0x500   : > { %v1595_v49 = vmax.f32 %v1570_v1, 0.0  ;;  %v1858_v1 = vadd.f32 %v1854_v50, %v1850_v59 }
 0x501   : > { %v1606_v61 = vpack.c.bf16 %v1594_v0, %v1592_v56 }
 0x502   : > { %v1607_v39 = vpack.c.bf16 %v1595_v49, %v1593_v2  ;;  %v1862_v56 = vsel %vm636_vm0, %v1858_v1, 0.0 }
 0x504   : > { %1618 = vmatprep.subr.bf16.mxu1 %v1607_v39 }
 0x505   : > { %1619 = vmatpush1.bf16.msra.mxu1 %v1606_v61 }
 0x506   : > { %2488 = vmatprep.subr.bf16.mxu1 %v2726_v11 }
 0x508   : > { %2400 = vmatmul.mubr.msk.bf16.vlgmr.msra.gmra.mrb[28].mxu1 %vm1127_vm9, %v3162_v10 }
 0x509   : > { %2490 = vmatprep.mubr.msk.bf16.mxu1 %vm2727_vm10, %v2726_v11 }
 0x50e   : > { %2489 = vmatpush3.bf16.xpose.msra.mxu1 %v1736_v18 }
 0x50f   : > { %2494 = vmatprep.subr.bf16.mxu1 %v2726_v11 }
 0x515   : > { %2491 = vmatmul.mubr.msk.bf16.vlgmr.msra.gmra.mrb[32].mxu1 %vm636_vm0, %v1730_v45 }
 0x516   : > { %2495 = vmatpush3.bf16.msra.mxu1 %v1802_v32  ;;  %2496 = vmatprep.mubr.msk.bf16.mxu1 %vm2727_vm10, %v2726_v11 }
 0x5db   : > { %v1642_v53 = vpop.f32.mrb[28].mxu1 }
 0x5dc   : > { %v1658_v10 = vrot.slane %v1642_v53, 5  ;;  %v1650_v43 = vrot.slane %v1642_v53, 7  ;;  %v1644_v46 = vpop.f32.mrb[29].mxu1  ;;  %v1662_v42 = vrot.slane %v1642_v53, 4  ;;  %v1654_v44 = vrot.slane %v1642_v53, 6 }
 0x5dd   : > { %v1646_v47 = vpop.f32.mrb[30].mxu1  ;;  %v1666_v29 = vrot.slane %v1642_v53, 3  ;;  %v1683_v31 = vrot.slane %v1644_v46, 6  ;;  %v1687_v45 = vrot.slane %v1644_v46, 5  ;;  %v1679_v11 = vrot.slane %v1644_v46, 7 }
 0x5de   : > { %1659 = vrot.lane.b32.xlu0 %v1658_v10, %s2730_s24  ;;  %1651 = vrot.lane.b32.xlu1 %v1650_v43, %s2728_s16  ;;  %v1647_v13 = vpop.f32.mrb[31].mxu1  ;;  %v1691_v5 = vrot.slane %v1644_v46, 4  ;;  %v1670_v6 = vrot.slane %v1642_v53, 2  ;;  %v1695_v8 = vrot.slane %v1644_v46, 3  ;;  %v1674_v14 = vrot.slane %v1642_v53, 1  ;;  %v1851_v43 = vld [vmem:[%s2885_s20 + $0x8] sm:$0xff] }
 0x5df   : > { %v1699_v12 = vrot.slane %v1644_v46, 2  ;;  %v1703_v23 = vrot.slane %v1644_v46, 1 }
 0x5e2   : > { %1663 = vrot.lane.b32.xlu0 %v1662_v42, %s2731_s27  ;;  %1655 = vrot.lane.b32.xlu1 %v1654_v44, %s2729_s18 }
 0x5e6   : > { %1667 = vrot.lane.b32.xlu0 %v1666_v29, %s2732_s21  ;;  %1684 = vrot.lane.b32.xlu1 %v1683_v31, %s2729_s18 }
 0x5e8   : > { %v1772_v32 = vpop.f32.mrb[32].mxu1 }
 0x5e9   : > { %v2492_v57 = vpop.f32.mrb[33].mxu1 }
 0x5ea   : > { %1688 = vrot.lane.b32.xlu1 %v1687_v45, %s2730_s24  ;;  %1680 = vrot.lane.b32.xlu0 %v1679_v11, %s2728_s16  ;;  %v1775_v9 = vpop.f32.mrb[34].mxu1  ;;  %s3448_s24 = scalar_lea.hbm %s3510_s15, %s2433_s26 }
 0x5eb   : > { %v2493_v4 = vpop.f32.mrb[35].mxu1 }
 0x5ee   : > { %1692 = vrot.lane.b32.xlu1 %v1691_v5, %s2731_s27  ;;  %1671 = vrot.lane.b32.xlu0 %v1670_v6, %s2733_s29  ;;  %s524_s27 = sand.u32 1, %s2714_s19  }
 0x5ef   : > { %s3454_s22 = scalar_lea.sflag [#allocation5], %s524_s27 }
 0x5f2   : > { %1696 = vrot.lane.b32.xlu1 %v1695_v8, %s2732_s21  ;;  %1675 = vrot.lane.b32.xlu0 %v1674_v14, %s2734_s17 }
 0x5f6   : > { %1700 = vrot.lane.b32.xlu1 %v1699_v12, %s2733_s29  ;;  %s2735_s29 = smov [#allocation4]  }
 0x5fa   : > { %1704 = vrot.lane.b32.xlu1 %v1703_v23, %s2734_s17  ;;  %s2347_s17 = sshll.u32 %s524_s27, 5 }
 0x5fb   : > { %s526_s25 = scalar_lea.vmem [#allocation4], %s2347_s17  ;;  %s2664_s17 = sshll.u32 %s2735_s29, 4  ;;  %s2665_s17 = int_to_ptr.vmem [resolvable:$false] %s2664_s17 }
 0x5fc   : > { %s2256_s30 = sshll.u32 %s526_s25, 4  ;;  %s3450_s30 = int_to_ptr.vmem [resolvable:$true] %s2256_s30 }
 0x5fd   : > { %s2660_s21 = scalar_lea.vmem %s3450_s30, 512  ;;  %p2667_p0 = scmp.lt.s32.totalorder %s3450_s30, %s2665_s17 }
 0x5fe   : > { %p2661_p11 = scmp.ne.s32.totalorder %s3450_s30, %s2660_s21 }
 0x600   : > { %p2662_p12 = pnand %p2661_p11, %p2856_p5 }
 0x602   : > { %p2663_p13 = pneg %p2662_p12 }
 0x650   : > { %v1660_v24 = vpop.permute.xlu0 %1659  ;;  %v1652_v25 = vpop.permute.xlu1 %1651 }
 0x651   : > { %v1707_v58 = vsel %vm867_vm4, %v1642_v53, %v1652_v25  ;;  %v1852_v25 = vld [vmem:[%s2885_s20 + $0x10] sm:$0xff] }
 0x654   : > { %v1664_v22 = vpop.permute.xlu0 %1663  ;;  %v1656_v34 = vpop.permute.xlu1 %1655 }
 0x655   : > { %v1708_v36 = vsel %vm870_vm5, %v1707_v58, %v1656_v34 }
 0x656   : > { %v1709_v40 = vsel %vm873_vm6, %v1708_v36, %v1660_v24 }
 0x657   : > { %v1710_v28 = vsel %vm876_vm7, %v1709_v40, %v1664_v22 }
 0x658   : > { %v1668_v26 = vpop.permute.xlu0 %1667  ;;  %v1685_v21 = vpop.permute.xlu1 %1684 }
 0x659   : > { %v1711_v37 = vsel %vm1234_vm11, %v1710_v28, %v1668_v26  ;;  %v1853_v26 = vld [vmem:[%s2885_s20 + $0x18] sm:$0xff]  ;;  %s2666_s20 = scalar_lea.vmem %s2665_s17, 1024 }
 0x65a   : > { %p2668_p1 = scmp.lt.s32.totalorder %s2666_s20, %s2660_s21 }
 0x65c   : > { %v1689_v27 = vpop.permute.xlu1 %1688  ;;  %v1681_v3 = vpop.permute.xlu0 %1680  ;;  %p2669_p2 = por %p2668_p1, %p2667_p0 }
 0x65d   : > { %v1714_v35 = vsel %vm867_vm4, %v1644_v46, %v1681_v3  ;;  %v1855_v46 = vld [vmem:[#allocation3 + $0x8] sm:$0xff] }
 0x65e   : > { %v1715_v7 = vsel %vm870_vm5, %v1714_v35, %v1685_v21  ;;  %v1859_v42 = vadd.f32 %v1855_v46, %v1851_v43  ;;  %v2610_v43 = vld [vmem:[%s3504_s9 + $0x10] sm:$0xff]   ;;  %v2611_v46 = vld [vmem:[%s3504_s9 + $0x18] sm:$0xff]   ;;  %p2670_p3 = pnand %p2669_p2, %p2663_p13 }
 0x65f   : > { %v1716_v51 = vsel %vm873_vm6, %v1715_v7, %v1689_v27 }
 0x660   : > { %v1693_v41 = vpop.permute.xlu1 %1692  ;;  %v1672_v19 = vpop.permute.xlu0 %1671  ;;  %v1865_v44 = vsel %vm636_vm0, %v1859_v42, 0.0 }
 0x661   : > { %v1712_v30 = vsel %vm1236_vm12, %v1711_v37, %v1672_v19  ;;  %v1717_v48 = vsel %vm876_vm7, %v1716_v51, %v1693_v41 }
 0x664   : > { %v1697_v33 = vpop.permute.xlu1 %1696  ;;  %v1676_v20 = vpop.permute.xlu0 %1675 }
 0x665   : > { %v1713_v15 = vsel %vm1238_vm13, %v1712_v30, %v1676_v20  ;;  %v1718_v55 = vsel %vm1234_vm11, %v1717_v48, %v1697_v33 }
 0x666   : > { %v1773_v38 = vadd.f32 %v1772_v32, %v1713_v15 }
 0x668   : > { %v1701_v54 = vpop.permute.xlu1 %1700  ;;  %v1779_v60 = vsel %vm1305_vm14, %v1773_v38, -inf }
 0x669   : > { %1780 = vmax.xlane.f32.xlu0 %v1779_v60  ;;  %v1719_v52 = vsel %vm1236_vm12, %v1718_v55, %v1701_v54 }
 0x66c   : > { %v1705_v62 = vpop.permute.xlu1 %1704 }
 0x66d   : > { %v1720_v16 = vsel %vm1238_vm13, %v1719_v52, %v1705_v62 }
 0x66e   : > { %v1776_v17 = vadd.f32 %v1775_v9, %v1720_v16 }
 0x670   : > { %v1782_v63 = vsel %vm1305_vm14, %v1776_v17, -inf }
 0x671   : > { %1783 = vmax.xlane.f32.xlu1 %v1782_v63 }
 0x675   : > { %1863 = vadd.xlane.f32.xlu1 %v1862_v56 }
 0x6f6   : > { %v1781_v0 = vpop.xlane.xlu0 %1780 }
 0x6f7   : > { %v1785_v2 = vsub.f32 %v1773_v38, %v1781_v0 }
 0x6f9   : > { %v1787_v49 = vmul.f32 1.442695, %v1785_v2  ;;  %v2404_v2 = vld [vmem:[%s3503_s8] ss:$0 sm:$0xff] }
 0x6fb   : > { %2636 = vpow2.f32 %v1787_v49 }
 0x6fe   : > { %v1784_v61 = vpop.xlane.xlu1 %1783 }
 0x6ff   : > { %v1786_v39 = vsub.f32 %v1776_v17, %v1784_v61  ;;  %v2403_v17 = vld [vmem:[%s3502_s7] ss:$0 sm:$0xff] }
 0x701   : > { %v1789_v18 = vmul.f32 1.442695, %v1786_v39 }
 0x702   : > { %v1864_v4 = vpop.xlane.xlu1 %1863 }
 0x703   : > { %2638 = vpow2.f32 %v1789_v18  ;;  %v1875_v12 = vmul.f32 0.015625, %v1864_v4 }
 0x705   : > { %v2637_v53 = vpop.eup %2636  ;;  %v1879_v22 = vsub.f32 %v1858_v1, %v1875_v12 }
 0x706   : > { %v1791_v10 = vsel %vm1305_vm14, %v2637_v53, 0.0 }
 0x707   : > { %1792 = vadd.xlane.f32.xlu0 %v1791_v10  ;;  %v1883_v40 = vmul.f32 %v1879_v22, %v1879_v22  ;;  %v2609_v10 = vld [vmem:[%s3504_s9 + $0x8] sm:$0xff]  }
 0x709   : > { %v1887_v19 = vsel %vm636_vm0, %v1883_v40, 0.0 }
 0x70d   : > { %v2639_v47 = vpop.eup %2638 }
 0x70e   : > { %v1794_v13 = vsel %vm1305_vm14, %v2639_v47, 0.0 }
 0x70f   : > { %1795 = vadd.xlane.f32.xlu0 %v1794_v13  ;;  %v2613_v13 = vld [vmem:[%s3506_s11 + $0x8] sm:$0xff]  }
 0x713   : > { %1866 = vadd.xlane.f32.xlu0 %v1865_v44  ;;  %v2615_v44 = vld [vmem:[%s3506_s11 + $0x18] sm:$0xff]  }
 0x794   : > { %v1793_v29 = vpop.xlane.xlu0 %1792 }
 0x795   : > { %2640 = vrcp.f32 %v1793_v29  ;;  %v2616_v29 = vld [vmem:[%s3506_s11 + $0x20] sm:$0xff]  }
 0x79c   : > { %v1796_v31 = vpop.xlane.xlu0 %1795 }
 0x79d   : > { %2642 = vrcp.f32 %v1796_v31  ;;  %v2617_v31 = vld [vmem:[%s3506_s11 + $0x28] sm:$0xff]  }
 0x79f   : > { %v2641_v32 = vpop.eup %2640 }
 0x7a0   : > { %v1798_v11 = vmul.f32 %v2641_v32, %v2637_v53  ;;  %v1867_v8 = vpop.xlane.xlu0 %1866  ;;  %v2608_v53 = vld [vmem:[%s3504_s9] sm:$0xff]  }
 0x7a1   : > { %v1876_v24 = vmul.f32 0.015625, %v1867_v8  ;;  %2500 = vmatprep.subr.bf16.mxu1 %v2608_v53 }
 0x7a3   : > { %v1880_v21 = vsub.f32 %v1859_v42, %v1876_v24  ;;  %v2614_v42 = vld [vmem:[%s3506_s11 + $0x10] sm:$0xff]  }
 0x7a5   : > { %v1884_v41 = vmul.f32 %v1880_v21, %v1880_v21 }
 0x7a7   : > { %v2643_v45 = vpop.eup %2642  ;;  %v1890_v35 = vsel %vm636_vm0, %v1884_v41, 0.0 }
 0x7a8   : > { %v1800_v57 = vmul.f32 %v2643_v45, %v2639_v47  ;;  %v2612_v47 = vld [vmem:[%s3506_s11] sm:$0xff]  }
 0x7a9   : > { %2512 = vmatprep.subr.bf16.mxu0 %v2612_v47 }
 0x7aa   : > { %v1801_v9 = vpack.c.bf16 %v1800_v57, %v1798_v11  ;;  %2513 = vmatpush3.bf16.msra.mxu0 %v2612_v47 }
 0x7ab   : > { %2514 = vmatprep.subr.bf16.mxu0 %v2613_v13 }
 0x7ac   : > { %2497 = vmatmul.mubr.msk.bf16.vlgmr.msra.gmra.mrb[36].mxu1 %vm1305_vm14, %v1801_v9 }
 0x7ad   : > { %2501 = vmatpush3.bf16.msra.mxu1 %v2608_v53 }
 0x7ae   : > { %2502 = vmatprep.subr.bf16.mxu1 %v2609_v10  ;;  %2515 = vmatpush3.bf16.msra.mxu0 %v2613_v13 }
 0x7af   : > { %2516 = vmatprep.subr.bf16.mxu0 %v2614_v42 }
 0x7b1   : > { %2503 = vmatpush3.bf16.msra.mxu1 %v2609_v10 }
 0x7b2   : > { %2504 = vmatprep.subr.bf16.mxu1 %v2610_v43  ;;  %2517 = vmatpush3.bf16.msra.mxu0 %v2614_v42 }
 0x7b3   : > { %2518 = vmatprep.subr.bf16.mxu0 %v2615_v44 }
 0x7b5   : > { %2505 = vmatpush3.bf16.msra.mxu1 %v2610_v43 }
 0x7b6   : > { %2506 = vmatprep.subr.bf16.mxu1 %v2611_v46  ;;  %2519 = vmatpush3.bf16.msra.mxu0 %v2615_v44 }
 0x7b7   : > { %2520 = vmatprep.subr.bf16.mxu0 %v2616_v29 }
 0x7b9   : > { %2507 = vmatpush3.bf16.msra.mxu1 %v2611_v46 }
 0x7ba   : > { %2521 = vmatpush3.bf16.msra.mxu0 %v2616_v29 }
 0x7bb   : > { %2522 = vmatprep.subr.bf16.mxu0 %v2617_v31 }
 0x7be   : > { %2523 = vmatpush3.bf16.msra.mxu0 %v2617_v31 }
 0x87f   : > { %v1840_v5 = vpop.f32.mrb[36].mxu1 }
 0x880   : > { %1848 = vst.msk [vmem:[#allocation3 + $0x10] sm:$0xff] %vm636_vm0, %v1840_v5  ;;  %v2498_v6 = vpop.f32.mrb[37].mxu1 }
 0x881   : > { %v1843_v14 = vpop.f32.mrb[38].mxu1 }
 0x882   : > { %1849 = vst.msk [vmem:[#allocation3 + $0x18] sm:$0xff] %vm636_vm0, %v1843_v14  ;;  %v2499_v23 = vpop.f32.mrb[39].mxu1 }
 0x887   : > { %v1856_v34 = vld [vmem:[#allocation3 + $0x10] sm:$0xff] }
 0x888   : > { %v1860_v58 = vadd.f32 %v1856_v34, %v1852_v25  ;;  %v2618_v34 = vld [vmem:[%s3506_s11 + $0x30] sm:$0xff]  }
 0x889   : > { %v1857_v36 = vld [vmem:[#allocation3 + $0x18] sm:$0xff]  ;;  %2524 = vmatprep.subr.bf16.mxu0 %v2618_v34 }
 0x88a   : > { %v1868_v27 = vsel %vm636_vm0, %v1860_v58, 0.0  ;;  %v1861_v3 = vadd.f32 %v1857_v36, %v1853_v26  ;;  %2525 = vmatpush3.bf16.msra.mxu0 %v2618_v34  ;;  %v2619_v26 = vld [vmem:[%s3506_s11 + $0x38] sm:$0xff]  }
 0x88b   : > { %1869 = vadd.xlane.f32.xlu1 %v1868_v27  ;;  %2526 = vmatprep.subr.bf16.mxu0 %v2619_v26 }
 0x88c   : > { %v1871_v28 = vsel %vm636_vm0, %v1861_v3, 0.0 }
 0x88d   : > { %1872 = vadd.xlane.f32.xlu0 %v1871_v28 }
 0x88e   : > { %2527 = vmatpush3.bf16.msra.mxu0 %v2619_v26 }
 0x88f   : > { %1888 = vadd.xlane.f32.xlu1 %v1887_v19 }
 0x891   : > { %1891 = vadd.xlane.f32.xlu0 %v1890_v35 }
 0x918   : > { %v1870_v37 = vpop.xlane.xlu1 %1869 }
 0x919   : > { %v1877_v7 = vmul.f32 0.015625, %v1870_v37 }
 0x91a   : > { %v1873_v30 = vpop.xlane.xlu0 %1872 }
 0x91b   : > { %v3357_v33 = vsub.f32 %v1860_v58, %v1877_v7  ;;  %v1878_v20 = vmul.f32 0.015625, %v1873_v30 }
 0x91c   : > { %v1889_v15 = vpop.xlane.xlu1 %1888 }
 0x91d   : > { %v3359_v38 = vsub.f32 %v1861_v3, %v1878_v20  ;;  %v1899_v51 = vmul.f32 0.015625, %v1889_v15  ;;  %v1885_v54 = vmul.f32 %v3357_v33, %v3357_v33  ;;  %v2412_v15 = vld [vmem:[%s3507_s12] ss:$0 sm:$0xff] }
 0x91e   : > { %v1892_v60 = vpop.xlane.xlu0 %1891 }
 0x91f   : > { %v1903_v48 = vadd.f32 1e-05, %v1899_v51  ;;  %v1900_v55 = vmul.f32 0.015625, %v1892_v60  ;;  %v1893_v52 = vsel %vm636_vm0, %v1885_v54, 0.0  ;;  %v1886_v62 = vmul.f32 %v3359_v38, %v3359_v38 }
 0x920   : > { %1894 = vadd.xlane.f32.xlu1 %v1893_v52 }
 0x921   : > { %2644 = vrsqrt.f32 %v1903_v48  ;;  %v1904_v16 = vadd.f32 1e-05, %v1900_v55  ;;  %v1896_v59 = vsel %vm636_vm0, %v1886_v62, 0.0 }
 0x922   : > { %1897 = vadd.xlane.f32.xlu0 %v1896_v59 }
 0x923   : > { %2646 = vrsqrt.f32 %v1904_v16 }
 0x92b   : > { %v2645_v50 = vpop.eup %2644 }
 0x92c   : > { %v1911_v63 = vmul.f32 %v2645_v50, %v1879_v22 }
 0x92d   : > { %v2647_v1 = vpop.eup %2646 }
 0x92e   : > { %v1912_v56 = vmul.f32 %v2647_v1, %v1880_v21  ;;  %v1922_v0 = vmul.f32 %v2403_v17, %v1911_v63  ;;  %v2405_v21 = vld [vmem:[%s3505_s10] ss:$0 sm:$0xff] }
 0x930   : > { %v1923_v49 = vmul.f32 %v2403_v17, %v1912_v56  ;;  %v3373_v61 = vadd.f32 %v2404_v2, %v1922_v0 }
 0x932   : > { %v3375_v39 = vadd.f32 %v2404_v2, %v1923_v49 }
 0x934   : > { %v1945_v18 = vpack.c.bf16 %v3375_v39, %v3373_v61 }
 0x936   : > { %2508 = vmatprep.mubr.msk.bf16.mxu1 %vm636_vm0, %v1945_v18 }
 0x9ad   : > { %v1895_v32 = vpop.xlane.xlu1 %1894 }
 0x9ae   : > { %v1901_v45 = vmul.f32 0.015625, %v1895_v32 }
 0x9af   : > { %v1898_v11 = vpop.xlane.xlu0 %1897 }
 0x9b0   : > { %v1905_v57 = vadd.f32 1e-05, %v1901_v45  ;;  %v1902_v9 = vmul.f32 0.015625, %v1898_v11 }
 0x9b2   : > { %2648 = vrsqrt.f32 %v1905_v57  ;;  %v1906_v4 = vadd.f32 1e-05, %v1902_v9 }
 0x9b4   : > { %2650 = vrsqrt.f32 %v1906_v4 }
 0x9bc   : > { %v2649_v5 = vpop.eup %2648 }
 0x9bd   : > { %v1913_v6 = vmul.f32 %v2649_v5, %v3357_v33 }
 0x9be   : > { %v2651_v8 = vpop.eup %2650 }
 0x9bf   : > { %v1924_v14 = vmul.f32 %v2403_v17, %v1913_v6  ;;  %v1914_v12 = vmul.f32 %v2651_v8, %v3359_v38 }
 0x9c1   : > { %v1925_v23 = vmul.f32 %v2403_v17, %v1914_v12  ;;  %v1935_v24 = vadd.f32 %v2404_v2, %v1924_v14 }
 0x9c3   : > { %v1936_v25 = vadd.f32 %v2404_v2, %v1925_v23 }
 0x9c5   : > { %v1946_v22 = vpack.c.bf16 %v1936_v25, %v1935_v24 }
 0x9c7   : > { %2509 = vmatmul.mubr.msk.bf16.vlgmr.msra.gmra.mrb[40].mxu1 %vm636_vm0, %v1946_v22 }
 0xa9a   : > { %v2510_v58 = vpop.f32.mrb[40].mxu1 }
 0xa9b   : > { %v2027_v36 = vadd.f32 %v2510_v58, %v2405_v21  ;;  %v2018_v27 = vpop.f32.mrb[41].mxu1  ;;  %v2421_v58 = vld [vmem:[%s3508_s13] ss:$0 sm:$0xff] }
 0xa9c   : > { %v2019_v3 = vadd.f32 %v2405_v21, %v2018_v27  ;;  %v2511_v40 = vpop.f32.mrb[42].mxu1 }
 0xa9d   : > { %v2030_v28 = vadd.f32 %v2511_v40, %v2405_v21  ;;  %v2021_v41 = vpop.f32.mrb[43].mxu1  ;;  %v2035_v35 = vmax.f32 %v2027_v36, 0.0 }
 0xa9e   : > { %v2022_v19 = vadd.f32 %v2405_v21, %v2021_v41  ;;  %v2033_v7 = vmax.f32 %v2019_v3, 0.0  ;;  %v2422_v3 = vld [vmem:[%s3509_s14] ss:$0 sm:$0xff] }
 0xa9f   : > { %v2036_v37 = vmax.f32 %v2030_v28, 0.0 }
 0xaa0   : > { %v2034_v30 = vmax.f32 %v2022_v19, 0.0 }
 0xaa1   : > { %v2054_v33 = vpack.c.bf16 %v2036_v37, %v2035_v35 }
 0xaa2   : > { %v2053_v20 = vpack.c.bf16 %v2034_v30, %v2033_v7 }
 0xaa4   : > { %2528 = vmatprep.mubr.bf16.mxu0 %v2053_v20 }
 0xaa5   : > { %2529 = vmatmul.mubr.bf16.vlgmr.msra.gmra.mrb[44].mxu0 %v2054_v33 }
 0xb78   : > { %v2530_v38 = vpop.f32.mrb[44].mxu0 }
 0xb79   : > { %v2144_v51 = vpop.f32.mrb[45].mxu0  ;;  %v2153_v54 = vadd.f32 %v2530_v38, %v2412_v15 }
 0xb7a   : > { %v2145_v60 = vadd.f32 %v2412_v15, %v2144_v51  ;;  %v2531_v48 = vpop.f32.mrb[46].mxu0 }
 0xb7b   : > { %v2147_v55 = vpop.f32.mrb[47].mxu0  ;;  %v2156_v52 = vadd.f32 %v2531_v48, %v2412_v15  ;;  %v2161_v17 = vadd.f32 %v2153_v54, %v1935_v24 }
 0xb7c   : > { %v2148_v62 = vadd.f32 %v2412_v15, %v2147_v55  ;;  %v2159_v16 = vadd.f32 %v2145_v60, %v3373_v61 }
 0xb7d   : > { %v2162_v1 = vadd.f32 %v2156_v52, %v1936_v25  ;;  %v2169_v56 = vsel %vm636_vm0, %v2161_v17, 0.0 }
 0xb7e   : > { %v2163_v59 = vsel %vm636_vm0, %v2159_v16, 0.0  ;;  %v2160_v50 = vadd.f32 %v2148_v62, %v3375_v39 }
 0xb7f   : > { %2164 = vadd.xlane.f32.xlu1 %v2163_v59  ;;  %v2172_v0 = vsel %vm636_vm0, %v2162_v1, 0.0 }
 0xb80   : > { %v2166_v63 = vsel %vm636_vm0, %v2160_v50, 0.0 }
 0xb81   : > { %2167 = vadd.xlane.f32.xlu0 %v2166_v63 }
 0xb83   : > { %2170 = vadd.xlane.f32.xlu1 %v2169_v56 }
 0xb85   : > { %2173 = vadd.xlane.f32.xlu0 %v2172_v0 }
 0xc0c   : > { %v2165_v2 = vpop.xlane.xlu1 %2164 }
 0xc0d   : > { %v2175_v49 = vmul.f32 0.015625, %v2165_v2 }
 0xc0e   : > { %v2168_v18 = vpop.xlane.xlu0 %2167 }
 0xc0f   : > { %v2179_v61 = vsub.f32 %v2159_v16, %v2175_v49  ;;  %v2176_v53 = vmul.f32 0.015625, %v2168_v18 }
 0xc10   : > { %v2171_v10 = vpop.xlane.xlu1 %2170 }
 0xc11   : > { %v2180_v43 = vsub.f32 %v2160_v50, %v2176_v53  ;;  %v2177_v39 = vmul.f32 0.015625, %v2171_v10  ;;  %v2183_v46 = vmul.f32 %v2179_v61, %v2179_v61 }
 0xc12   : > { %v2174_v47 = vpop.xlane.xlu0 %2173 }
 0xc13   : > { %v2181_v13 = vsub.f32 %v2161_v17, %v2177_v39  ;;  %v2178_v42 = vmul.f32 0.015625, %v2174_v47  ;;  %v2187_v44 = vsel %vm636_vm0, %v2183_v46, 0.0  ;;  %v2184_v29 = vmul.f32 %v2180_v43, %v2180_v43 }
 0xc14   : > { %2188 = vadd.xlane.f32.xlu1 %v2187_v44 }
 0xc15   : > { %v2182_v31 = vsub.f32 %v2162_v1, %v2178_v42  ;;  %v2190_v32 = vsel %vm636_vm0, %v2184_v29, 0.0  ;;  %v2185_v45 = vmul.f32 %v2181_v13, %v2181_v13 }
 0xc16   : > { %2191 = vadd.xlane.f32.xlu0 %v2190_v32 }
 0xc17   : > { %v2193_v11 = vsel %vm636_vm0, %v2185_v45, 0.0  ;;  %v2186_v57 = vmul.f32 %v2182_v31, %v2182_v31 }
 0xc18   : > { %2194 = vadd.xlane.f32.xlu1 %v2193_v11 }
 0xc19   : > { %v2196_v9 = vsel %vm636_vm0, %v2186_v57, 0.0 }
 0xc1a   : > { %2197 = vadd.xlane.f32.xlu0 %v2196_v9 }
 0xca1   : > { %v2189_v4 = vpop.xlane.xlu1 %2188 }
 0xca2   : > { %v2199_v5 = vmul.f32 0.015625, %v2189_v4 }
 0xca3   : > { %v2192_v6 = vpop.xlane.xlu0 %2191 }
 0xca4   : > { %v2203_v8 = vadd.f32 1e-05, %v2199_v5  ;;  %v2200_v14 = vmul.f32 0.015625, %v2192_v6 }
 0xca5   : > { %v2195_v12 = vpop.xlane.xlu1 %2194 }
 0xca6   : > { %2652 = vrsqrt.f32 %v2203_v8  ;;  %v2204_v23 = vadd.f32 1e-05, %v2200_v14  ;;  %v2201_v24 = vmul.f32 0.015625, %v2195_v12 }
 0xca7   : > { %v2198_v25 = vpop.xlane.xlu0 %2197 }
 0xca8   : > { %2654 = vrsqrt.f32 %v2204_v23  ;;  %v2205_v22 = vadd.f32 1e-05, %v2201_v24  ;;  %v2202_v34 = vmul.f32 0.015625, %v2198_v25 }
 0xcaa   : > { %2656 = vrsqrt.f32 %v2205_v22  ;;  %v2206_v26 = vadd.f32 1e-05, %v2202_v34 }
 0xcac   : > { %2658 = vrsqrt.f32 %v2206_v26 }
 0xcb0   : > { %v2653_v21 = vpop.eup %2652 }
 0xcb1   : > { %v2211_v36 = vmul.f32 %v2653_v21, %v2179_v61 }
 0xcb2   : > { %v2655_v27 = vpop.eup %2654 }
 0xcb3   : > { %v2222_v40 = vmul.f32 %v2421_v58, %v2211_v36  ;;  %v2212_v28 = vmul.f32 %v2655_v27, %v2180_v43 }
 0xcb4   : > { %v2657_v41 = vpop.eup %2656 }
 0xcb5   : > { %v2233_v19 = vadd.f32 %v2422_v3, %v2222_v40  ;;  %v2223_v35 = vmul.f32 %v2421_v58, %v2212_v28  ;;  %v2213_v37 = vmul.f32 %v2657_v41, %v2181_v13 }
 0xcb6   : > { %v2659_v7 = vpop.eup %2658 }
 0xcb7   : > { %v2234_v30 = vadd.f32 %v2422_v3, %v2223_v35  ;;  %v2224_v33 = vmul.f32 %v2421_v58, %v2213_v37  ;;  %v2214_v20 = vmul.f32 %v2659_v7, %v2182_v31  ;;  %2237 = vst.msk [vmem:[%s526_s25] sm:$0xff] %vm636_vm0, %v2233_v19 }
 0xcb9   : > { %v2235_v15 = vadd.f32 %v2422_v3, %v2224_v33  ;;  %v2225_v38 = vmul.f32 %v2421_v58, %v2214_v20  ;;  %2238 = vst.msk [vmem:[%s526_s25 + $0x8] sm:$0xff] %vm636_vm0, %v2234_v30 }
 0xcbb   : > { %v2236_v51 = vadd.f32 %v2422_v3, %v2225_v38  ;;  %2239 = vst.msk [vmem:[%s526_s25 + $0x10] sm:$0xff] %vm636_vm0, %v2235_v15 }
 0xcbd   : > { %2240 = vst.msk [vmem:[%s526_s25 + $0x18] sm:$0xff] %vm636_vm0, %v2236_v51 }
 0xcbe   : > { %2673 = shalt.err (!%p2670_p3)
}
 0xcbf   : > { %s2674_s27 = scalar_lea.hbm %s3448_s24, 512  ;;  %s2678_s26 = scalar_lea.hbm %s3510_s15, 1024 }
 0xcc0   : > { %p2675_p4 = scmp.ne.s32.totalorder %s3448_s24, %s2674_s27  ;;  %p2679_p9 = scmp.lt.u32.totalorder %s3448_s24, %s3510_s15 }
 0xcc1   : > { %p2680_p10 = scmp.lt.u32.totalorder %s2678_s26, %s2674_s27  ;;  %p2682_p12 = scmp.lt.u32.totalorder %s2674_s27, %s3448_s24 }
 0xcc2   : > { %p2676_p7 = pnand %p2675_p4, %p2856_p5 }
 0xcc3   : > { %p2681_p11 = por %p2680_p10, %p2679_p9 }
 0xcc4   : > { %p2677_p8 = pneg %p2676_p7 }
 0xcc5   : > { %p2683_p13 = por %p2682_p12, %p2681_p11 }
 0xcc7   : > { %p2684_p0 = pnand %p2683_p13, %p2677_p8 }
 0xcc9   : > { %2687 = shalt.err (!%p2684_p0)
}
 0xcca   : > { %s2736_s21 = smov 128   ;;  %s2737_s29 = smov 8  }
 0xccb   : > { %2532 = dma.vmem_to_hbm [thread:$0]  (%p2856_p5), %s3450_s30, 512, %s3448_s24, %s3454_s22, %s2736_s21, %s2736_s21, %s2737_s29  }
 0xccc PF: > { %s3525_s17 = sld [smem:[#allocation9_spill]]  ;;  %s3526_s20 = sld [smem:[#allocation7_spill]] }
 0xcd2   : > { %p2538_p1 = scmp.ge.s32.totalorder %s3525_s17, 2  ;;  %s2271_s25 = sand.u32 1, %s3526_s20  }
 0xcd3   : > { %s2272_s27 = scalar_lea.sflag [#allocation5], %s2271_s25 }
 0xcd4   : > { %p2535_p2 = pnand %p2538_p1, %p2860_p6 }
 0xcd6   : > { %2705 = dma.done.wait (!%p2535_p2), %s2272_s27, 512  }
 0xcd7   : > { %2707 = vsyncadd (!%p2535_p2), %s2272_s27, 4294966784  ;;  %s3528_s21 = sld [smem:[#allocation10_spill]]  ;;  %s3529_s26 = sld [smem:[#allocation8_spill]] }
 0xcd8   : > { %s3530_s20 = sld [smem:[#allocation11_spill]]  ;;  %s3531_s18 = smov %s2714_s19 }
 0xcdd   : > { %p25_p3 = scmp.ge.s32.totalorder %s3528_s21, 4   ;;  %s3532_s19 = smov %s3529_s26 }
 0xcdf   :  { %27 = sbr.rel (!%p25_p3) target bundleno = 3 (0x3), region = 126 }
 0xce6   :  { %2277 = vsyncpa [#allocation5], 1 }
 0xce7   :  { %2279 = vsyncpa [#allocation5 + $0x1], 1 }

</bundles_post_ra>
